<compile_context>
chip_gen: v5e
topology: v5e:2x2
jax: 0.10.0
libtpu: 0.0.40
codegen_flags: <defaults>
</compile_context>

<pallas_src>
import functools

import jax
import jax.numpy as jnp
import numpy as np
from jax.experimental import pallas as pl
from jax.experimental.pallas import tpu as pltpu


def _convlstm_kernel(xw_ref, w_ref, b_ref, peep_ref, c_ref, out_ref, *,
                     ch, k, rows, w_img):
    """One (batch, row-tile) block per grid step.

    xw_ref   : (1, (tile_h+2p)*W, KP) bf16  dx-folded, H-halo'd activation rows
    w_ref    : (k, KP, 4Ch)           bf16  per-dy fused [i|f|o|c] conv weights
    b_ref    : (1, 4Ch)               f32   fused input-conv biases
    peep_ref : (rows, 4Ch)            bf16  [W_ci | W_cf | W_co | 0] for this row tile
    c_ref    : (rows, Ch)             f32   previous cell state for this block
    out_ref  : (rows, 4Ch)            f32   [o_gate | h_new | c_new | tanh(cand)]
    """
    # k MXU matmuls (one per vertical tap), each a lane-dense (rows, KP)x(KP, 4Ch)
    # bf16 matmul with f32 accumulation.  Each tap is an aligned contiguous
    # sublane slice of the halo'd block: no reshapes, no relayouts.
    pre = None
    for dy in range(k):
        tap = xw_ref[0, dy * w_img: dy * w_img + rows, :]          # (rows, KP) bf16
        part = jnp.dot(tap, w_ref[dy], preferred_element_type=jnp.float32)
        pre = part if pre is None else pre + part

    # Bias + peephole: build the 4-gate broadcast of c in-kernel (XLU lane
    # concat, no extra HBM stream), then one full-width 128-lane VPU FMA.
    c_prev = c_ref[...]                                            # (rows, Ch) f32
    c4 = jnp.concatenate([c_prev, c_prev, c_prev, c_prev], axis=-1)
    pre = pre + b_ref[...] + peep_ref[...].astype(jnp.float32) * c4

    # Transcendentals: sigmoid over the full 128-lane vreg (wasted g-block
    # lanes are cheaper than a 96-lane relayout), tanh only on the g block.
    sig = jax.nn.sigmoid(pre)
    g = jnp.tanh(pre[:, 3 * ch:])                                  # (rows, Ch)

    ig = sig[:, 0 * ch:1 * ch]
    fg = sig[:, 1 * ch:2 * ch]
    og = sig[:, 2 * ch:3 * ch]

    c_new = fg * c_prev + ig * g
    h_new = og * c_new

    # One lane-dense 128-wide store; lanes 96:128 carry tanh(candidate) as a
    # reusable residual (not a duplicated c_new).
    out_ref[...] = jnp.concatenate([og, h_new, c_new, g], axis=-1)


def _pick_tile_h(batch, height, width, max_rows=1024, min_blocks=4):
    """Largest divisor of H whose row block fits `max_rows` rows, preferring a
    grid with >= min_blocks steps (so both v7x TensorCores get >=2 blocks)."""
    cands = [d for d in range(1, height + 1)
             if height % d == 0 and (d * width) % 8 == 0 and d * width <= max_rows]
    if not cands:
        return height                      # degenerate shapes: one block per image
    pref = [d for d in cands if batch * (height // d) >= min_blocks]
    return max(pref) if pref else max(cands)


def conv_lstm_cell(x, h, c, params, *, max_rows_per_block=1024):
    """Pallas ConvLSTMCell forward. Returns (output, h_new, c_new), all NHWC."""
    B, H, W, Cin = x.shape
    Ch = c.shape[-1]
    k = params["wx"].shape[0]
    p = k // 2
    G = 4 * Ch
    C = Cin + Ch
    KP = ((k * C + 127) // 128) * 128      # lane-dense contraction dim

    tile_h = _pick_tile_h(B, H, W, max_rows=max_rows_per_block)
    nt = H // tile_h
    rows = tile_h * W
    halo_rows = (tile_h + 2 * p) * W
    nblk = B * nt

    # ---- activations: cast to bf16 BEFORE any expansion ----------------------
    xh = jnp.concatenate([x, h], axis=-1).astype(jnp.bfloat16)        # (B,H,W,C)
    xh_p = jnp.pad(xh, ((0, 0), (p, p), (p, p), (0, 0)))              # (B,Hp,Wp,C)
    # Fold only the k horizontal taps into channels (k-fold, not k*k-fold).
    xw = jnp.concatenate([xh_p[:, :, dx:dx + W, :] for dx in range(k)], axis=-1)
    xw = jnp.pad(xw, ((0, 0), (0, 0), (0, 0), (0, KP - k * C)))       # (B,Hp,W,KP)
    # Halo'd row tiles flattened so each kernel block is 2D (rows x KP) and the
    # per-dy tap is a contiguous aligned sublane slice.
    xt = jnp.stack([xw[:, t * tile_h: t * tile_h + tile_h + 2 * p]
                    for t in range(nt)], axis=1)                      # (B,nt,th+2p,W,KP)
    xt = xt.reshape(nblk, halo_rows, KP)

    # ---- per-dy fused weights (KP, 4Ch); row order matches the dx fold -------
    wx, wh = params["wx"], params["wh"]
    w_dy = [jnp.concatenate([jnp.concatenate([wx[dy, dx], wh[dy, dx]], axis=0)
                             for dx in range(k)], axis=0)             # (k*C, 4Ch)
            for dy in range(k)]
    w_all = jnp.stack(w_dy, axis=0)                                   # (k, k*C, 4Ch)
    w_all = jnp.pad(w_all, ((0, 0), (0, KP - k * C), (0, 0))).astype(jnp.bfloat16)

    bias = params["b"].reshape(1, G).astype(jnp.float32)
    peep = jnp.concatenate(
        [params["wci"].reshape(H * W, Ch), params["wcf"].reshape(H * W, Ch),
         params["wco"].reshape(H * W, Ch), jnp.zeros((H * W, Ch), jnp.float32)],
        axis=-1).astype(jnp.bfloat16)                                 # (HW, 4Ch)
    c_rows = c.reshape(B * H * W, Ch).astype(jnp.float32)

    kernel = functools.partial(_convlstm_kernel, ch=Ch, k=k, rows=rows, w_img=W)

    slab = pl.pallas_call(
        kernel,
        out_shape=jax.ShapeDtypeStruct((B * H * W, G), jnp.float32),
        grid=(nblk,),
        in_specs=[
            pl.BlockSpec((1, halo_rows, KP), lambda i: (i, 0, 0)),    # activations
            pl.BlockSpec((k, KP, G), lambda i: (0, 0, 0)),            # fused weights
            pl.BlockSpec((1, G), lambda i: (0, 0)),                   # bias
            pl.BlockSpec((rows, G), lambda i: (i % nt, 0)),           # peephole rows
            pl.BlockSpec((rows, Ch), lambda i: (i, 0)),               # cell state
        ],
        out_specs=pl.BlockSpec((rows, G), lambda i: (i, 0)),
        compiler_params=pltpu.CompilerParams(
            dimension_semantics=("parallel",),
            vmem_limit_bytes=32 * 1024 * 1024),
    )(xt, w_all, bias, peep, c_rows)

    # Wrapper-side split of the slab (consumers can read the slab directly to
    # avoid this extra read; the torch interface requires three tensors).
    slab = slab.reshape(B, H, W, G)
    og = slab[..., 0 * Ch:1 * Ch]
    h_new = slab[..., 1 * Ch:2 * Ch]
    c_new = slab[..., 2 * Ch:3 * Ch]
    # slab[..., 3*Ch:] = tanh(candidate), a reusable residual (unused here).
    return og, h_new, c_new


def conv_lstm_cell_reference(x, h, c, params):
    """Pure-JAX reference (lax conv, f32 HIGHEST) with identical semantics."""
    Ch = c.shape[-1]

    def conv(inp, w):
        return jax.lax.conv_general_dilated(
            inp, w, window_strides=(1, 1), padding="SAME",
            dimension_numbers=("NHWC", "HWIO", "NHWC"),
            precision=jax.lax.Precision.HIGHEST)

    pre = conv(x, params["wx"]) + conv(h, params["wh"]) \
        + params["b"].reshape(1, 1, 1, 4 * Ch)
    wci = params["wci"][None]
    wcf = params["wcf"][None]
    wco = params["wco"][None]

    ig = jax.nn.sigmoid(pre[..., 0 * Ch:1 * Ch] + wci * c)
    fg = jax.nn.sigmoid(pre[..., 1 * Ch:2 * Ch] + wcf * c)
    og = jax.nn.sigmoid(pre[..., 2 * Ch:3 * Ch] + wco * c)
    c_new = fg * c + ig * jnp.tanh(pre[..., 3 * Ch:4 * Ch])
    h_new = og * c_new
    return og, h_new, c_new


def init_params(key, input_channels, hidden_channels, kernel_size, spatial):
    """Deterministic synthetic parameters (gate order: [i, f, o, c])."""
    ks = jax.random.split(key, 6)
    k = kernel_size
    scale = 0.1
    wx = scale * jax.random.normal(
        ks[0], (k, k, input_channels, 4 * hidden_channels), jnp.float32)
    wh = scale * jax.random.normal(
        ks[1], (k, k, hidden_channels, 4 * hidden_channels), jnp.float32)
    b = scale * jax.random.normal(ks[2], (4 * hidden_channels,), jnp.float32)
    # Peephole weights are zero-init in the torch module; use small random
    # values here so the term is actually exercised.
    H, W = spatial
    wci = scale * jax.random.normal(ks[3], (H, W, hidden_channels), jnp.float32)
    wcf = scale * jax.random.normal(ks[4], (H, W, hidden_channels), jnp.float32)
    wco = scale * jax.random.normal(ks[5], (H, W, hidden_channels), jnp.float32)
    return {"wx": wx, "wh": wh, "b": b, "wci": wci, "wcf": wcf, "wco": wco}


if __name__ == "__main__":
    B, Cin, Ch, H, W, K = 2, 4, 32, 16, 16, 3

    key = jax.random.PRNGKey(0)
    kx, kh, kc, kp = jax.random.split(key, 4)
    x = jax.random.normal(kx, (B, H, W, Cin), jnp.float32)
    h = jax.random.normal(kh, (B, H, W, Ch), jnp.float32)
    c = jax.random.normal(kc, (B, H, W, Ch), jnp.float32)
    params = init_params(kp, Cin, Ch, K, (H, W))

    out, h_new, c_new = jax.block_until_ready(conv_lstm_cell(x, h, c, params))

    ref_out, ref_h, ref_c = conv_lstm_cell_reference(x, h, c, params)
    # Kernel runs the conv as bf16 MXU matmuls with f32 accumulation; the
    # reference is f32 HIGHEST.  Tolerance tightened vs v2 (5e-2 -> 2e-2).
    # TODO(synk): add a multi-step temporal unroll drift test for bf16 h.
    np.testing.assert_allclose(np.asarray(out), np.asarray(ref_out),
                               rtol=2e-2, atol=2e-2)
    np.testing.assert_allclose(np.asarray(h_new), np.asarray(ref_h),
                               rtol=2e-2, atol=2e-2)
    np.testing.assert_allclose(np.asarray(c_new), np.asarray(ref_c),
                               rtol=2e-2, atol=2e-2)

    print("KERNEL_OK")
</pallas_src>

<mosaic_0001>
module attributes {stable_mosaic.version = 11 : i64} {
  func.func @_convlstm_kernel(%arg0: i32, %arg1: memref<1x160x128xbf16, #tpu.memory_space<vmem>>, %arg2: memref<3x128x128xbf16, #tpu.memory_space<vmem>>, %arg3: memref<1x128xf32, #tpu.memory_space<vmem>>, %arg4: memref<128x128xbf16, #tpu.memory_space<vmem>>, %arg5: memref<128x32xf32, #tpu.memory_space<vmem>>, %arg6: memref<128x128xf32, #tpu.memory_space<vmem>>) attributes {dimension_semantics = [#tpu.dimension_semantics<parallel>], iteration_bounds = array<i64: 4>, scalar_prefetch = 0 : i64, scratch_operands = 0 : i64, tpu.core_type = #tpu.core_type<tc>, window_params = [{transform_indices = @transform_0, window_bounds = array<i64: 1, 160, 128>}, {pipeline_mode = #tpu.pipeline_mode<synchronous>, transform_indices = @transform_1, window_bounds = array<i64: 3, 128, 128>}, {pipeline_mode = #tpu.pipeline_mode<synchronous>, transform_indices = @transform_2, window_bounds = array<i64: 1, 128>}, {transform_indices = @transform_3, window_bounds = array<i64: 128, 128>}, {transform_indices = @transform_4, window_bounds = array<i64: 128, 32>}, {transform_indices = @transform_5, window_bounds = array<i64: 128, 128>}]} {
    %c0 = arith.constant 0 : index
    %c0_0 = arith.constant 0 : index
    %c0_1 = arith.constant 0 : index
    %0 = vector.load %arg1[%c0, %c0_0, %c0_1] : memref<1x160x128xbf16, #tpu.memory_space<vmem>>, vector<1x128x128xbf16>
    %1 = vector.shape_cast %0 : vector<1x128x128xbf16> to vector<128x128xbf16>
    %c0_2 = arith.constant 0 : index
    %c0_3 = arith.constant 0 : index
    %c0_4 = arith.constant 0 : index
    %2 = vector.load %arg2[%c0_2, %c0_3, %c0_4] : memref<3x128x128xbf16, #tpu.memory_space<vmem>>, vector<1x128x128xbf16>
    %3 = vector.shape_cast %2 : vector<1x128x128xbf16> to vector<128x128xbf16>
    %cst = arith.constant dense<0.000000e+00> : vector<128x128xf32>
    %4 = tpu.matmul %1, %3, %cst {dimension_numbers = #tpu.dot_dimension_numbers<[1], [0], [0], [1], [0, 0, 1, 1], [], []>} : vector<128x128xbf16>, vector<128x128xbf16>, vector<128x128xf32> -> vector<128x128xf32>
    %c0_5 = arith.constant 0 : index
    %c16 = arith.constant 16 : index
    %c0_6 = arith.constant 0 : index
    %5 = vector.load %arg1[%c0_5, %c16, %c0_6] : memref<1x160x128xbf16, #tpu.memory_space<vmem>>, vector<1x128x128xbf16>
    %6 = vector.shape_cast %5 : vector<1x128x128xbf16> to vector<128x128xbf16>
    %c1 = arith.constant 1 : index
    %c0_7 = arith.constant 0 : index
    %c0_8 = arith.constant 0 : index
    %7 = vector.load %arg2[%c1, %c0_7, %c0_8] : memref<3x128x128xbf16, #tpu.memory_space<vmem>>, vector<1x128x128xbf16>
    %8 = vector.shape_cast %7 : vector<1x128x128xbf16> to vector<128x128xbf16>
    %cst_9 = arith.constant dense<0.000000e+00> : vector<128x128xf32>
    %9 = tpu.matmul %6, %8, %cst_9 {dimension_numbers = #tpu.dot_dimension_numbers<[1], [0], [0], [1], [0, 0, 1, 1], [], []>} : vector<128x128xbf16>, vector<128x128xbf16>, vector<128x128xf32> -> vector<128x128xf32>
    %10 = arith.addf %4, %9 : vector<128x128xf32>
    %c0_10 = arith.constant 0 : index
    %c32 = arith.constant 32 : index
    %c0_11 = arith.constant 0 : index
    %11 = vector.load %arg1[%c0_10, %c32, %c0_11] : memref<1x160x128xbf16, #tpu.memory_space<vmem>>, vector<1x128x128xbf16>
    %12 = vector.shape_cast %11 : vector<1x128x128xbf16> to vector<128x128xbf16>
    %c2 = arith.constant 2 : index
    %c0_12 = arith.constant 0 : index
    %c0_13 = arith.constant 0 : index
    %13 = vector.load %arg2[%c2, %c0_12, %c0_13] : memref<3x128x128xbf16, #tpu.memory_space<vmem>>, vector<1x128x128xbf16>
    %14 = vector.shape_cast %13 : vector<1x128x128xbf16> to vector<128x128xbf16>
    %cst_14 = arith.constant dense<0.000000e+00> : vector<128x128xf32>
    %15 = tpu.matmul %12, %14, %cst_14 {dimension_numbers = #tpu.dot_dimension_numbers<[1], [0], [0], [1], [0, 0, 1, 1], [], []>} : vector<128x128xbf16>, vector<128x128xbf16>, vector<128x128xf32> -> vector<128x128xf32>
    %16 = arith.addf %10, %15 : vector<128x128xf32>
    %c0_15 = arith.constant 0 : index
    %c0_16 = arith.constant 0 : index
    %17 = vector.load %arg5[%c0_15, %c0_16] : memref<128x32xf32, #tpu.memory_space<vmem>>, vector<128x32xf32>
    %18 = tpu.concatenate %17, %17, %17, %17 in 1 : vector<128x32xf32>, vector<128x32xf32>, vector<128x32xf32>, vector<128x32xf32> -> vector<128x128xf32>
    %c0_17 = arith.constant 0 : index
    %c0_18 = arith.constant 0 : index
    %19 = vector.load %arg3[%c0_17, %c0_18] : memref<1x128xf32, #tpu.memory_space<vmem>>, vector<1x128xf32>
    %20 = vector.broadcast %19 : vector<1x128xf32> to vector<128x128xf32>
    %21 = arith.addf %16, %20 : vector<128x128xf32>
    %c0_19 = arith.constant 0 : index
    %c0_20 = arith.constant 0 : index
    %22 = vector.load %arg4[%c0_19, %c0_20] : memref<128x128xbf16, #tpu.memory_space<vmem>>, vector<128x128xbf16>
    %23 = arith.extf %22 : vector<128x128xbf16> to vector<128x128xf32>
    %24 = arith.mulf %23, %18 : vector<128x128xf32>
    %25 = arith.addf %21, %24 : vector<128x128xf32>
    %26 = arith.negf %25 : vector<128x128xf32>
    %27 = math.exp %26 : vector<128x128xf32>
    %cst_21 = arith.constant 1.000000e+00 : f32
    %28 = vector.broadcast %cst_21 : f32 to vector<128x128xf32>
    %29 = arith.addf %28, %27 : vector<128x128xf32>
    %30 = arith.divf %28, %29 : vector<128x128xf32>
    %31 = vector.extract_strided_slice %25 {offsets = [0, 96], sizes = [128, 32], strides = [1, 1]} : vector<128x128xf32> to vector<128x32xf32>
    %32 = math.tanh %31 : vector<128x32xf32>
    %33 = vector.extract_strided_slice %30 {offsets = [0, 0], sizes = [128, 32], strides = [1, 1]} : vector<128x128xf32> to vector<128x32xf32>
    %34 = vector.extract_strided_slice %30 {offsets = [0, 32], sizes = [128, 32], strides = [1, 1]} : vector<128x128xf32> to vector<128x32xf32>
    %35 = vector.extract_strided_slice %30 {offsets = [0, 64], sizes = [128, 32], strides = [1, 1]} : vector<128x128xf32> to vector<128x32xf32>
    %36 = arith.mulf %34, %17 : vector<128x32xf32>
    %37 = arith.mulf %33, %32 : vector<128x32xf32>
    %38 = arith.addf %36, %37 : vector<128x32xf32>
    %39 = arith.mulf %35, %38 : vector<128x32xf32>
    %40 = tpu.concatenate %35, %39, %38, %32 in 1 : vector<128x32xf32>, vector<128x32xf32>, vector<128x32xf32>, vector<128x32xf32> -> vector<128x128xf32>
    %c0_22 = arith.constant 0 : index
    %c0_23 = arith.constant 0 : index
    %41 = vector.load %arg6[%c0_22, %c0_23] : memref<128x128xf32, #tpu.memory_space<vmem>>, vector<128x128xf32>
    tpu.vector_store %arg6[%c0_22, %c0_23], %40 {strides = array<i32>} : memref<128x128xf32, #tpu.memory_space<vmem>>, vector<128x128xf32>,
    return
  }
  func.func @transform_0(%arg0: i32) -> (i32, i32, i32) {
    %c0_i32 = arith.constant 0 : i32
    %c0_i32_0 = arith.constant 0 : i32
    %c0_i32_1 = arith.constant 0 : i32
    return %arg0, %c0_i32, %c0_i32_0 : i32, i32, i32
  }
  func.func @transform_1(%arg0: i32) -> (i32, i32, i32) {
    %c0_i32 = arith.constant 0 : i32
    %c0_i32_0 = arith.constant 0 : i32
    %c0_i32_1 = arith.constant 0 : i32
    %c0_i32_2 = arith.constant 0 : i32
    return %c0_i32, %c0_i32_0, %c0_i32_1 : i32, i32, i32
  }
  func.func @transform_2(%arg0: i32) -> (i32, i32) {
    %c0_i32 = arith.constant 0 : i32
    %c0_i32_0 = arith.constant 0 : i32
    %c0_i32_1 = arith.constant 0 : i32
    return %c0_i32, %c0_i32_0 : i32, i32
  }
  func.func @transform_3(%arg0: i32) -> (i32, i32) {
    %c2_i32 = arith.constant 2 : i32
    %c0_i32 = arith.constant 0 : i32
    %0 = arith.cmpi eq, %c2_i32, %c0_i32 : i32
    %c1_i32 = arith.constant 1 : i32
    %1 = arith.select %0, %c1_i32, %c2_i32 : i32
    %2 = arith.remsi %arg0, %1 : i32
    %c0_i32_0 = arith.constant 0 : i32
    %3 = arith.cmpi ne, %2, %c0_i32_0 : i32
    %c0_i32_1 = arith.constant 0 : i32
    %4 = arith.cmpi slt, %2, %c0_i32_1 : i32
    %c0_i32_2 = arith.constant 0 : i32
    %5 = arith.cmpi slt, %1, %c0_i32_2 : i32
    %6 = arith.xori %4, %5 : i1
    %7 = arith.andi %6, %3 : i1
    %8 = arith.addi %2, %1 : i32
    %9 = arith.select %7, %8, %2 : i32
    %c0_i32_3 = arith.constant 0 : i32
    %c0_i32_4 = arith.constant 0 : i32
    return %9, %c0_i32_3 : i32, i32
  }
  func.func @transform_4(%arg0: i32) -> (i32, i32) {
    %c0_i32 = arith.constant 0 : i32
    %c0_i32_0 = arith.constant 0 : i32
    return %arg0, %c0_i32 : i32, i32
  }
  func.func @transform_5(%arg0: i32) -> (i32, i32) {
    %c0_i32 = arith.constant 0 : i32
    %c0_i32_0 = arith.constant 0 : i32
    return %arg0, %c0_i32 : i32, i32
  }
}

</mosaic_0001>

<bundles_post_ra>
// kernel: tpu_custom_call.1
= control target key start
LH: loop header
LB: loop body
LE: loop exit
PB: predicated region body
PF: predicated region fallthrough
CT: control target
= control target key end

     0   :  { %10 = vsyncpa [#allocation3], 0  ;;  %s4089_s0 = inlined_call_operand.vmem [shape: bf16[4,160,128], index: 0, kind: input, shape index: {}]   ;;  %s4090_s1 = inlined_call_operand.vmem [shape: bf16[3,128,128], index: 1, kind: input, shape index: {}]   ;;  %s4091_s2 = inlined_call_operand.hbm [shape: f32[1,128], index: 2, kind: input, shape index: {}]   ;;  %s4092_s3 = inlined_call_operand.vmem [shape: bf16[256,128], index: 3, kind: input, shape index: {}]   ;;  %s4093_s4 = inlined_call_operand.vmem [shape: f32[512,32], index: 4, kind: input, shape index: {}]   ;;  %s4094_s5 = inlined_call_operand.hbm [shape: f32[512,128], index: 5, kind: output, shape index: {}]  }
   0x1   :  { %11 = vsyncpa [#allocation4], 0 }
   0x2   :  { %13 = vsyncpa [#allocation4 + $0x1], 0  ;;  %s2683_s18 = smov 0   ;;  %s2685_s19 = smov 0  }
   0x3   :  { %s2687_s20 = smov 0   ;;  %s2689_s21 = smov 0  }
   0x4 LB: > { %s2704_s22 = sadd.s32 4294967295, %s2645_s21   ;;  %s2053_s23 = sadd.s32 4294967294, %s2645_s21   ;;  %s2645_s21 = sphi %s2689_s21, %s4166_s21   ;;  %s2641_s20 = sphi %s2687_s20, %s4165_s20   ;;  %s2637_s19 = sphi %s2685_s19, %s4164_s19   ;;  %s2633_s18 = sphi %s2683_s18, %s4163_s18  }
   0x5   : > { %s2708_s24 = sadd.s32 1, %s2645_s21   ;;  %s170_s25 = sadd.s32 1, %s2641_s20 }
   0x6   : > { %s167_s26 = ssub.s32 %s2645_s21, %s2708_s24  ;;  %p180_p0 = scmp.ne.s32.totalorder %s2641_s20, %s2637_s19 }
   0x7   : > { %p168_p1 = scmp.eq.s32.totalorder %s167_s26, 0  ;;  %p181_p2 = scmp.eq.s32.totalorder %s2704_s22, 3 }
   0x8   : > { %p186_p3 = scmp.ne.s32.totalorder %s2637_s19, %s2633_s18  ;;  %p187_p4 = scmp.eq.s32.totalorder %s2053_s23, 3 }
   0x9   : > { %s2719_s27 = scalar_select %p168_p1, %s2641_s20, %s170_s25  }
   0xa   : > { %p2721_p5 = por %p181_p2, %p180_p0  ;;  %p2725_p6 = por %p187_p4, %p186_p3 }
   0xb   : > { %p2060_p7 = scmp.ge.s32.totalorder %s2645_s21, 1  ;;  %p194_p8 = scmp.lt.s32.totalorder %s2645_s21, 5 }
   0xc   : > { %p2411_p9 = scmp.eq.s32.totalorder %s2704_s22, 0  ;;  %s209_s7 = sshll.u32 %s4091_s2, 4  ;;  %s210_s7 = int_to_ptr.hbm [resolvable:$true] %s209_s7 }
   0xd   : > { %p195_p10 = pnand %p2060_p7, %p194_p8  ;;  %s2647_s8 = smov [#allocation2]  }
   0xe   : > { %s211_s9 = sshll.u32 %s2647_s8, 4  ;;  %s212_s9 = int_to_ptr.vmem [resolvable:$true] %s211_s9 }
   0xf   : > { %p2403_p11 = pneg %p195_p10  ;;  %274 = sbr.rel (%p195_p10) target bundleno = 772 (0x304), region = 40 }
  0x11   : > { %p2404_p12 = pnand %p2411_p9, %p2403_p11 }
  0x13   : > { %2406 = dma.hbm_to_vmem [thread:$0]  (!%p2404_p12), %s210_s7, 16, %s212_s9, [#allocation3]  }
  0x14   : > { %2624 = dma.done.wait (%p2411_p9), [#allocation3], 16  }
  0x15   : > { %2626 = vsyncadd (%p2411_p9), [#allocation3], 4294967280  ;;  %s2072_s10 = sshll.u32 %s2704_s22, 4  ;;  %s2648_s15 = smov 32   ;;  %v2315_v3 = vld [vmem:[%s4090_s1 + $0x78] sm:$0xff]  ;;  %v2314_v6 = vld [vmem:[%s4090_s1 + $0x70] sm:$0xff] }
  0x16   : > { %p361_p13 = scmp.lt.s32.totalorder %s2072_s10, 63  ;;  %v2760_v4 = vld [vmem:[%s4090_s1 + $0xb8] sm:$0xff]  ;;  %2372 = vmatpush.bf16.msra.mxu3 %v2315_v3  ;;  %v2776_v7 = vld [vmem:[%s4090_s1 + $0xb0] sm:$0xff]  ;;  %514 = vmatpush.bf16.msra.mxu0 %v2315_v3  ;;  %v2313_v12 = vld [vmem:[%s4090_s1 + $0x68] sm:$0xff]  ;;  %p325_p0 = scmp.lt.s32.totalorder %s2704_s22, 3  ;;  %vm1036_vm0 = vcmask 261120  }
  0x17   : > { %v2767_v5 = vld [vmem:[%s4090_s1 + $0x38] sm:$0xff]  ;;  %795 = vmatpush.bf16.msra.mxu2 %v2760_v4  ;;  %v2782_v8 = vld [vmem:[%s4090_s1 + $0x30] sm:$0xff]  ;;  %v2800_v13 = vld [vmem:[%s4090_s1 + $0xa8] sm:$0xff]  ;;  %s331_s12 = ssub.s32 0, %s2704_s22  ;;  %p330_p1 = scmp.lt.s32.totalorder %s2704_s22, 0  ;;  %vm1070_vm1 = vcmask 785408  }
  0x18   : > { %s4168_s10 = smov (!%p361_p13, %s2072_s10), 63  ;;  %617 = vmatpush.bf16.msra.mxu1 %v2767_v5  ;;  %v2806_v14 = vld [vmem:[%s4090_s1 + $0x28] sm:$0xff]  ;;  %v2312_v15 = vld [vmem:[%s4090_s1 + $0x60] sm:$0xff]  ;;  %v2311_v21 = vld [vmem:[%s4090_s1 + $0x58] sm:$0xff]  ;;  %vm1053_vm2 = vcmask 523264   ;;  %s2599_s30 = scalar_lea.hbm %s4094_s5, 512 }
  0x19   : > { %s2073_s11 = sshll.u32 %s4168_s10, 3  ;;  %v2821_v16 = vld [vmem:[%s4090_s1 + $0xa0] sm:$0xff]  ;;  %v2845_v22 = vld [vmem:[%s4090_s1 + $0x98] sm:$0xff]  ;;  %v2310_v24 = vld [vmem:[%s4090_s1 + $0x50] sm:$0xff]  ;;  %s2332_s10 = sshll.u32 %s2704_s22, 7 }
  0x1a   : > { %s2739_s14 = scalar_lea.vmem %s4093_s4, %s2073_s11  ;;  %2373 = vmatpush.bf16.msra.mxu3 %v2314_v6  ;;  %515 = vmatpush.bf16.msra.mxu0 %v2314_v6  ;;  %v2827_v17 = vld [vmem:[%s4090_s1 + $0x20] sm:$0xff]  ;;  %v2302_v23 = vld [vmem:[%s4090_s1 + $0x18] sm:$0xff]  ;;  %v2865_v25 = vld [vmem:[%s4090_s1 + $0x90] sm:$0xff]  ;;  %s2649_s11 = smov 64  }
  0x1b   : > { %v2742_v0 = vld [vmem:[%s2739_s14 + $0x20] sm:$0xff]  ;;  %v2745_v1 = vld [vmem:[%s2739_s14 + $0x10] sm:$0xff]  ;;  %v2785_v9 = vld [vmem:[%s2739_s14 + $0x28] sm:$0xff]  ;;  %796 = vmatpush.bf16.msra.mxu2 %v2776_v7  ;;  %s326_s6 = scalar_select %p325_p0, %s2704_s22, 3 }
  0x1c   : > { %v2748_v2 = vld [vmem:[%s2739_s14] sm:$0xff]  ;;  %900 = vrot.lane.b32.xlu2 %v2742_v0, %s2648_s15  ;;  %896 = vrot.lane.b32.xlu1 %v2745_v1, %s2648_s15  ;;  %v2788_v10 = vld [vmem:[%s2739_s14 + $0x18] sm:$0xff] }
  0x1d   : > { %892 = vrot.lane.b32.xlu0 %v2748_v2, %s2648_s15  ;;  %v2792_v11 = vld [vmem:[%s2739_s14 + $0x8] sm:$0xff]  ;;  %618 = vmatpush.bf16.msra.mxu1 %v2782_v8  ;;  %v2830_v18 = vld [vmem:[%s2739_s14 + $0x40] sm:$0xff]  ;;  %v2833_v19 = vld [vmem:[%s2739_s14 + $0x38] sm:$0xff]  ;;  %s2396_s13 = smul.u32 80, %s326_s6 }
  0x1e   : > { %2374 = vmatpush.bf16.msra.mxu3 %v2313_v12  ;;  %516 = vmatpush.bf16.msra.mxu0 %v2313_v12  ;;  %v2837_v20 = vld [vmem:[%s2739_s14 + $0x30] sm:$0xff]  ;;  %v2872_v27 = vld [vmem:[%s2739_s14 + $0x58] sm:$0xff]  ;;  %v2879_v29 = vld [vmem:[%s2739_s14 + $0x48] sm:$0xff] }
  0x1f   : > { %797 = vmatpush.bf16.msra.mxu2 %v2800_v13  ;;  %v2301_v26 = vld [vmem:[%s4090_s1 + $0x10] sm:$0xff]  ;;  %v2309_v30 = vld [vmem:[%s4090_s1 + $0x48] sm:$0xff]  ;;  %v2308_v33 = vld [vmem:[%s4090_s1 + $0x40] sm:$0xff]  ;;  %s2910_s8 = scalar_lea.vmem %s4089_s0, %s2396_s13  ;;  %s2067_s13 = smin.u32 %s2704_s22, %s331_s12 }
  0x20   : > { %v2875_v28 = vld [vmem:[%s2739_s14 + $0x50] sm:$0xff]  ;;  %v2887_v31 = vld [vmem:[%s4090_s1 + $0x88] sm:$0xff]  ;;  %v2905_v34 = vld [vmem:[%s4090_s1 + $0x80] sm:$0xff]  ;;  %s333_s16 = sand.u32 1, %s2067_s13   ;;  %s1951_s12 = scalar_lea.hbm %s4094_s5, %s2332_s10 }
  0x21   : > { %619 = vmatpush.bf16.msra.mxu1 %v2806_v14  ;;  %v2300_v32 = vld [vmem:[%s4090_s1 + $0x8] sm:$0xff]  ;;  %v2913_v35 = vld [vmem:[%s2739_s14 + $0x70] sm:$0xff]  ;;  %v2919_v37 = vld [vmem:[%s2910_s8 + $0x38] sm:$0xff]  ;;  %s334_s17 = ssub.s32 0, %s333_s16 }
  0x22   : > { %2375 = vmatpush.bf16.msra.mxu3 %v2312_v15  ;;  %517 = vmatpush.bf16.msra.mxu0 %v2312_v15  ;;  %v2916_v36 = vld [vmem:[%s2739_s14 + $0x68] sm:$0xff]  ;;  %v2923_v38 = vld [vmem:[%s2739_s14 + $0x60] sm:$0xff]  ;;  %v2316_v39 = vld [vmem:[%s2910_s8 + $0x10] sm:$0xff]  ;;  %s4170_s17 = smov (!%p330_p1, %s334_s17), %s333_s16  ;;  %s1954_s16 = sshll.u32 %s1951_s12, 4  ;;  %s1955_s16 = int_to_ptr.hbm [resolvable:$true] %s1954_s16 }
  0x23   : > { %798 = vmatpush.bf16.msra.mxu2 %v2821_v16  ;;  %v2299_v40 = vld [vmem:[%s4090_s1] sm:$0xff]  ;;  %v2292_v41 = vld [vmem:[%s2910_s8 + $0x8] sm:$0xff]  ;;  %v2941_v43 = vld [vmem:[%s2739_s14 + $0x78] sm:$0xff]  ;;  %s2650_s14 = smov 96   ;;  %p2069_p2 = scmp.lt.s32.totalorder %s4170_s17, 0 }
  0x24   : > { %902 = vrot.lane.b32.xlu2 %v2785_v9, %s2648_s15  ;;  %898 = vrot.lane.b32.xlu1 %v2788_v10, %s2648_s15  ;;  %v2291_v42 = vld [vmem:[%s2910_s8] sm:$0xff]  ;;  %v2317_v45 = vld [vmem:[%s2910_s8 + $0x18] sm:$0xff]  ;;  %s340_s23 = sadd.s32 2, %s4170_s17 }
  0x25   : > { %894 = vrot.lane.b32.xlu0 %v2792_v11, %s2648_s15  ;;  %620 = vmatpush.bf16.msra.mxu1 %v2827_v17  ;;  %v2307_v44 = vld [vmem:[%s2910_s8 + $0x40] sm:$0xff]  ;;  %v2293_v46 = vld [vmem:[%s2910_s8 + $0x10] sm:$0xff]  ;;  %v2294_v49 = vld [vmem:[%s2910_s8 + $0x18] sm:$0xff]  ;;  %s4172_s23 = smov (!%p2069_p2, %s340_s23), %s4170_s17  ;;  %s2593_s17 = sshra.s32 %s1955_s16, 4  ;;  %s2594_s17 = int_to_ptr.hbm [resolvable:$true] %s2593_s17 }
  0x26   : > { %2376 = vmatpush.bf16.msra.mxu3 %v2311_v21  ;;  %518 = vmatpush.bf16.msra.mxu0 %v2311_v21  ;;  %v2297_v47 = vld [vmem:[%s2910_s8 + $0x30] sm:$0xff]  ;;  %v2318_v48 = vld [vmem:[%s2910_s8 + $0x20] sm:$0xff]  ;;  %v2319_v50 = vld [vmem:[%s2910_s8 + $0x28] sm:$0xff]  ;;  %s2070_s25 = sshll.u32 %s4172_s23, 4  ;;  %s2595_s23 = scalar_lea.hbm %s2594_s17, 128 }
  0x27   : > { %799 = vmatpush.bf16.msra.mxu2 %v2845_v22  ;;  %v2295_v51 = vld [vmem:[%s2910_s8 + $0x20] sm:$0xff]  ;;  %v2320_v54 = vld [vmem:[%s2910_s8 + $0x30] sm:$0xff]  ;;  %v2296_v55 = vld [vmem:[%s2910_s8 + $0x28] sm:$0xff]  ;;  %p343_p3 = scmp.lt.s32.totalorder %s2070_s25, 31  ;;  %p2596_p4 = scmp.ne.s32.totalorder %s2594_s17, %s2595_s23 }
  0x28   : > { %v2322_v53 = vld [vmem:[%s2910_s8 + $0x40] sm:$0xff]  ;;  %v2323_v58 = vld [vmem:[%s2910_s8 + $0x48] sm:$0xff]  ;;  %v2321_v59 = vld [vmem:[%s2910_s8 + $0x38] sm:$0xff]  ;;  %p2600_p9 = scmp.lt.s32.totalorder %s2594_s17, %s4094_s5  ;;  %p2601_p10 = scmp.lt.s32.totalorder %s2599_s30, %s2595_s23 }
  0x29   : > { %621 = vmatpush.bf16.msra.mxu1 %v2302_v23  ;;  %s4174_s25 = smov (!%p343_p3, %s2070_s25), 31  ;;  %p2597_p7 = pnand %p2596_p4, %p2721_p5 }
  0x2a   : > { %2377 = vmatpush.bf16.msra.mxu3 %v2310_v24  ;;  %519 = vmatpush.bf16.msra.mxu0 %v2310_v24  ;;  %s2071_s26 = sshll.u32 %s4174_s25, 2  ;;  %p2602_p11 = por %p2601_p10, %p2600_p9 }
  0x2b   : > { %800 = vmatpush.bf16.msra.mxu2 %v2865_v25  ;;  %s3081_s7 = scalar_lea.vmem %s4092_s3, %s2071_s26  ;;  %p2598_p8 = pneg %p2597_p7 }
  0x2c   : > { %908 = vrot.lane.b32.xlu2 %v2830_v18, %s2648_s15  ;;  %906 = vrot.lane.b32.xlu1 %v2833_v19, %s2648_s15 }
  0x2d   : > { %904 = vrot.lane.b32.xlu0 %v2837_v20, %s2648_s15  ;;  %622 = vmatpush.bf16.msra.mxu1 %v2301_v26  ;;  %p2603_p12 = pnand %p2602_p11, %p2598_p8 }
  0x2e   : > { %2378 = vmatpush.bf16.msra.mxu3 %v2309_v30  ;;  %520 = vmatpush.bf16.msra.mxu0 %v2309_v30 }
  0x2f   : > { %801 = vmatpush.bf16.msra.mxu2 %v2887_v31 }
  0x31   : > { %623 = vmatpush.bf16.msra.mxu1 %v2300_v32 }
  0x32   : > { %2379 = vmatpush.bf16.msra.mxu3 %v2308_v33  ;;  %521 = vmatpush.bf16.msra.mxu0 %v2308_v33 }
  0x33   : > { %802 = vmatpush.bf16.msra.mxu2 %v2905_v34 }
  0x34   : > { %914 = vrot.lane.b32.xlu2 %v2872_v27, %s2648_s15  ;;  %912 = vrot.lane.b32.xlu1 %v2875_v28, %s2648_s15 }
  0x35   : > { %910 = vrot.lane.b32.xlu0 %v2879_v29, %s2648_s15  ;;  %552 = vmatmul.bf16.vlgmr.msra.gmra.mxu3 %v2919_v37 }
  0x36   : > { %2380 = vmatpush.bf16.msrb.mxu3 %v2767_v5  ;;  %803 = vmatmul.bf16.vlgmr.msra.gmra.mxu2 %v2316_v39  ;;  %v3090_v39 = vld [vmem:[#allocation2] ss:$0 sm:$0xff] }
  0x37   : > { %624 = vmatpush.bf16.msra.mxu1 %v2299_v40  ;;  %522 = vmatmul.bf16.vlgmr.msra.gmra.mxu0 %v2292_v41 }
  0x3a   : > { %2381 = vmatpush.bf16.msrb.mxu3 %v2782_v8  ;;  %625 = vmatmul.bf16.vlgmr.msra.gmra.mxu1 %v2291_v42 }
  0x3c   : > { %920 = vrot.lane.b32.xlu2 %v2913_v35, %s2648_s15  ;;  %918 = vrot.lane.b32.xlu1 %v2916_v36, %s2648_s15 }
  0x3d   : > { %916 = vrot.lane.b32.xlu0 %v2923_v38, %s2648_s15 }
  0x3e   : > { %2382 = vmatpush.bf16.msrb.mxu3 %v2806_v14 }
  0x42   : > { %2383 = vmatpush.bf16.msrb.mxu3 %v2827_v17 }
  0x44   : > { %942 = vrot.lane.b32.xlu2 %v2792_v11, %s2649_s11  ;;  %940 = vrot.lane.b32.xlu1 %v2748_v2, %s2649_s11 }
  0x45   : > { %922 = vrot.lane.b32.xlu0 %v2941_v43, %s2648_s15  ;;  %557 = vmatmul.bf16.gmra.mxu3 %v2307_v44 }
  0x46   : > { %2384 = vmatpush.bf16.msrb.mxu3 %v2302_v23  ;;  %808 = vmatmul.bf16.gmra.mxu2 %v2317_v45 }
  0x47   : > { %527 = vmatmul.bf16.gmra.mxu0 %v2293_v46 }
  0x4a   : > { %2385 = vmatpush.bf16.msrb.mxu3 %v2301_v26  ;;  %630 = vmatmul.bf16.gmra.mxu1 %v2292_v41 }
  0x4c   : > { %948 = vrot.lane.b32.xlu2 %v2742_v0, %s2649_s11  ;;  %946 = vrot.lane.b32.xlu1 %v2788_v10, %s2649_s11 }
  0x4d   : > { %944 = vrot.lane.b32.xlu0 %v2745_v1, %s2649_s11 }
  0x4e   : > { %2386 = vmatpush.bf16.msrb.mxu3 %v2300_v32 }
  0x52   : > { %2387 = vmatpush.bf16.msrb.mxu3 %v2299_v40 }
  0x54   : > { %954 = vrot.lane.b32.xlu2 %v2833_v19, %s2649_s11  ;;  %952 = vrot.lane.b32.xlu1 %v2837_v20, %s2649_s11 }
  0x55   : > { %950 = vrot.lane.b32.xlu0 %v2785_v9, %s2649_s11  ;;  %655 = vmatmul.bf16.vlgmr.msrb.gmra.mxu3 %v2297_v47 }
  0x56   : > { %2388 = vmatpush.bf16.msra.mxu3 %v2760_v4  ;;  %813 = vmatmul.bf16.gmra.mxu2 %v2318_v48 }
  0x57   : > { %532 = vmatmul.bf16.gmra.mxu0 %v2294_v49 }
  0x5a   : > { %2389 = vmatpush.bf16.msra.mxu3 %v2776_v7  ;;  %635 = vmatmul.bf16.gmra.mxu1 %v2293_v46 }
  0x5c   : > { %960 = vrot.lane.b32.xlu2 %v2875_v28, %s2649_s11  ;;  %958 = vrot.lane.b32.xlu1 %v2879_v29, %s2649_s11 }
  0x5d   : > { %956 = vrot.lane.b32.xlu0 %v2830_v18, %s2649_s11 }
  0x5e   : > { %2390 = vmatpush.bf16.msra.mxu3 %v2800_v13 }
  0x62   : > { %2391 = vmatpush.bf16.msra.mxu3 %v2821_v16 }
  0x64   : > { %966 = vrot.lane.b32.xlu2 %v2916_v36, %s2649_s11  ;;  %964 = vrot.lane.b32.xlu1 %v2923_v38, %s2649_s11 }
  0x65   : > { %962 = vrot.lane.b32.xlu0 %v2872_v27, %s2649_s11  ;;  %660 = vmatmul.bf16.gmra.mxu3 %v2919_v37 }
  0x66   : > { %2392 = vmatpush.bf16.msra.mxu3 %v2845_v22  ;;  %818 = vmatmul.bf16.gmra.mxu2 %v2319_v50 }
  0x67   : > { %537 = vmatmul.bf16.gmra.mxu0 %v2295_v51 }
  0x6a   : > { %2393 = vmatpush.bf16.msra.mxu3 %v2865_v25  ;;  %640 = vmatmul.bf16.gmra.mxu1 %v2294_v49 }
  0x6c   : > { %988 = vrot.lane.b32.xlu2 %v2748_v2, %s2650_s14  ;;  %970 = vrot.lane.b32.xlu1 %v2941_v43, %s2649_s11 }
  0x6d   : > { %968 = vrot.lane.b32.xlu0 %v2913_v35, %s2649_s11 }
  0x6e   : > { %2394 = vmatpush.bf16.msra.mxu3 %v2887_v31 }
  0x72   : > { %2395 = vmatpush.bf16.msra.mxu3 %v2905_v34  ;;  %v3088_v34 = vld [vmem:[%s3081_s7] sm:$0xff]  }
  0x73   : > { %v2335_v40 = vunpack.c.l.bf16 %v3088_v34 }
  0x74   : > { %994 = vrot.lane.b32.xlu2 %v2788_v10, %s2650_s14  ;;  %992 = vrot.lane.b32.xlu1 %v2745_v1, %s2650_s14 }
  0x75   : > { %990 = vrot.lane.b32.xlu0 %v2792_v11, %s2650_s14  ;;  %833 = vmatmul.bf16.vlgmr.msra.gmra.mxu3 %v2322_v53 }
  0x76   : > { %v3003_v52 = vpop.permute.xlu2 %900  ;;  %823 = vmatmul.bf16.gmra.mxu2 %v2320_v54 }
  0x77   : > { %542 = vmatmul.bf16.gmra.mxu0 %v2296_v55 }
  0x7a   : > { %645 = vmatmul.bf16.gmra.mxu1 %v2295_v51 }
  0x7c   : > { %1000 = vrot.lane.b32.xlu2 %v2837_v20, %s2650_s14  ;;  %998 = vrot.lane.b32.xlu1 %v2785_v9, %s2650_s14 }
  0x7d   : > { %996 = vrot.lane.b32.xlu0 %v2742_v0, %s2650_s14 }
  0x7e   : > { %v3015_v56 = vpop.permute.xlu2 %902 }
  0x84   : > { %1006 = vrot.lane.b32.xlu2 %v2879_v29, %s2650_s14  ;;  %1004 = vrot.lane.b32.xlu1 %v2830_v18, %s2650_s14 }
  0x85   : > { %1002 = vrot.lane.b32.xlu0 %v2833_v19, %s2650_s14  ;;  %838 = vmatmul.bf16.gmra.mxu3 %v2323_v58 }
  0x86   : > { %v3023_v57 = vpop.permute.xlu2 %908  ;;  %828 = vmatmul.bf16.gmra.mxu2 %v2321_v59 }
  0x87   : > { %547 = vmatmul.bf16.gmra.mxu0 %v2297_v47 }
  0x8a   : > { %650 = vmatmul.bf16.gmra.mxu1 %v2296_v55 }
  0x8c   : > { %1012 = vrot.lane.b32.xlu2 %v2923_v38, %s2650_s14  ;;  %1010 = vrot.lane.b32.xlu1 %v2872_v27, %s2650_s14 }
  0x8d   : > { %1008 = vrot.lane.b32.xlu0 %v2875_v28, %s2650_s14 }
  0x8e   : > { %v3033_v60 = vpop.permute.xlu2 %914  ;;  %v3035_v61 = vpop.permute.xlu1 %896 }
  0x8f   : > { %v3037_v62 = vpop.permute.xlu0 %892 }
  0x90   : > { %4106 = vst [vmem:[#allocation8_spill] sm:$0xff] %v3037_v62  ;;  %v1037_v42 = vsel %vm1036_vm0, %v2748_v2, %v3037_v62 }
  0x94   : > { %1018 = vrot.lane.b32.xlu2 %v2941_v43, %s2650_s14  ;;  %1016 = vrot.lane.b32.xlu1 %v2913_v35, %s2650_s14 }
  0x95   : > { %1014 = vrot.lane.b32.xlu0 %v2916_v36, %s2650_s14 }
  0x96   : > { %v3045_v63 = vpop.permute.xlu2 %920  ;;  %v3047_v3 = vpop.permute.xlu1 %898 }
  0x97   : > { %4107 = vst [vmem:[#allocation9_spill] sm:$0xff] %v3047_v3  ;;  %v3049_v4 = vpop.permute.xlu0 %894 }
  0x9e   : > { %v3053_v5 = vpop.permute.xlu1 %906  ;;  %v3055_v6 = vpop.permute.xlu2 %942 }
  0x9f   : > { %v3057_v7 = vpop.permute.xlu0 %904 }
  0xa6   : > { %v3060_v8 = vpop.permute.xlu1 %912  ;;  %v3062_v12 = vpop.permute.xlu2 %948 }
  0xa7   : > { %4108 = vst [vmem:[#allocation10_spill] sm:$0xff] %v3060_v8  ;;  %v3064_v13 = vpop.permute.xlu0 %910 }
  0xae   : > { %v3066_v14 = vpop.permute.xlu1 %918  ;;  %v3068_v15 = vpop.permute.xlu2 %954 }
  0xaf   : > { %v3070_v16 = vpop.permute.xlu0 %916 }
  0xb4   : > { %v523_v23 = vpop.f32.mrf.mxu0 }
  0xb6   : > { %v3072_v17 = vpop.permute.xlu2 %960  ;;  %v941_v21 = vpop.permute.xlu1 %940 }
  0xb7   : > { %v3074_v22 = vpop.permute.xlu0 %922  ;;  %v626_v30 = vpop.f32.mrf.mxu1  ;;  %v1054_v44 = vsel %vm1053_vm2, %v1037_v42, %v941_v21 }
  0xb8   : > { %4109 = vst [vmem:[#allocation11_spill] sm:$0xff] %v3074_v22  ;;  %v627_v31 = vadd.f32 %v626_v30, %v523_v23  ;;  %v3085_v32 = vpop.f32.mrf.mxu3 }
  0xb9   : > { %4111 = vst [vmem:[#allocation13_spill] sm:$0xff] %v3085_v32  ;;  %v804_v33 = vpop.f32.mrf.mxu2 }
  0xba   : > { %v844_v37 = vadd.f32 %v804_v33, %v627_v31 }
  0xbc   : > { %v3093_v41 = vpop.f32.mrf.mxu0  ;;  %v1091_v45 = vadd.f32 %v3090_v39, %v844_v37 }
  0xbe   : > { %v3076_v24 = vpop.permute.xlu2 %966  ;;  %v947_v25 = vpop.permute.xlu1 %946 }
  0xbf   : > { %4110 = vst [vmem:[#allocation12_spill] sm:$0xff] %v3076_v24  ;;  %v3083_v26 = vpop.permute.xlu0 %944  ;;  %v3105_v50 = vpop.f32.mrf.mxu1 }
  0xc0   : > { %v3107_v53 = vpop.f32.mrf.mxu3 }
  0xc1   : > { %4112 = vst [vmem:[#allocation14_spill] sm:$0xff] %v3107_v53  ;;  %v3109_v54 = vpop.f32.mrf.mxu2 }
  0xc4   : > { %v528_v58 = vpop.f32.mrf.mxu0 }
  0xc6   : > { %v989_v46 = vpop.permute.xlu2 %988  ;;  %v3100_v47 = vpop.permute.xlu1 %952 }
  0xc7   : > { %v1071_v48 = vsel %vm1070_vm1, %v1054_v44, %v989_v46  ;;  %v3103_v49 = vpop.permute.xlu0 %950  ;;  %v631_v30 = vpop.f32.mrf.mxu1 }
  0xc8   : > { %v1139_v51 = vmul.f32 %v2335_v40, %v1071_v48  ;;  %v3113_v31 = vpop.f32.mrf.mxu3 }
  0xc9   : > { %4114 = vst [vmem:[#allocation16_spill] sm:$0xff] %v3113_v31  ;;  %v809_v33 = vpop.f32.mrf.mxu2 }
  0xca   : > { %v1155_v2 = vadd.f32 %v1139_v51, %v1091_v45  ;;  %v3122_v45 = vld [vmem:[%s3081_s7 + $0x8] sm:$0xff]   ;;  %v1040_v51 = vsel %vm1036_vm0, %v2788_v10, %v3047_v3 }
  0xcc   : > { %v2270_v55 = vmul.f32 -1.442695, %v1155_v2  ;;  %2453 = vtanh.f32 %v1155_v2  ;;  %v530_v42 = vpop.f32.mrf.mxu0 }
  0xce   : > { %2455 = vpow2.f32 %v2270_v55  ;;  %v995_v59 = vpop.permute.xlu2 %994  ;;  %v959_v21 = vpop.permute.xlu1 %958 }
  0xcf   : > { %v3111_v23 = vpop.permute.xlu0 %956  ;;  %v633_v55 = vpop.f32.mrf.mxu1 }
  0xd0   : > { %4113 = vst [vmem:[#allocation15_spill] sm:$0xff] %v3111_v23  ;;  %v634_v62 = vadd.f32 %v633_v55, %v530_v42  ;;  %v3136_v31 = vpop.f32.mrf.mxu3 }
  0xd1   : > { %v811_v32 = vpop.f32.mrf.mxu2 }
  0xd2   : > { %v3115_v37 = vpop.eup %2453  ;;  %v847_v23 = vadd.f32 %v811_v32, %v634_v62  ;;  %v1038_v62 = vsel %vm1036_vm0, %v2792_v11, %v3049_v4  ;;  %v1046_v32 = vsel %vm1036_vm0, %v2879_v29, %v3064_v13  ;;  %v3175_v11 = vsel %vm1036_vm0, %v2872_v27, %v3033_v60 }
  0xd3   : > { %4115 = vst [vmem:[#allocation17_spill] sm:$0xff] %v3115_v37  ;;  %1523 = vrot.lane.b32.xlu0 %v3115_v37, %s2648_s15  ;;  %v1057_v37 = vsel %vm1053_vm2, %v1040_v51, %v947_v25  ;;  %v1041_v25 = vsel %vm1036_vm0, %v2742_v0, %v3003_v52  ;;  %v3170_v51 = vsel %vm1036_vm0, %v2830_v18, %v3023_v57 }
  0xd4   : > { %v2456_v40 = vpop.eup %2455  ;;  %v1074_v53 = vsel %vm1070_vm1, %v1057_v37, %v995_v59  ;;  %v1094_v10 = vadd.f32 %v3090_v39, %v847_v23  ;;  %v3152_v59 = vsel %vm1036_vm0, %v2785_v9, %v3015_v56  ;;  %v632_v23 = vadd.f32 %v631_v30, %v528_v58 }
  0xd5   : > { %v3119_v44 = vadd.f32 1.0, %v2456_v40  ;;  %v2340_v40 = vunpack.c.h.bf16 %v3122_v45  ;;  %v1039_v29 = vsel %vm1036_vm0, %v2745_v1, %v3035_v61  ;;  %v3186_v30 = vsel %vm1036_vm0, %v2913_v35, %v3045_v63 }
  0xd6   : > { %v3124_v46 = vpop.permute.xlu2 %1000  ;;  %v3126_v48 = vpop.permute.xlu1 %964  ;;  %v1044_v18 = vsel %vm1036_vm0, %v2833_v19, %v3053_v5  ;;  %v1055_v1 = vsel %vm1053_vm2, %v1038_v62, %v3055_v6  ;;  %v629_v35 = vadd.f32 %v3105_v50, %v3093_v41  ;;  %v1047_v19 = vsel %vm1036_vm0, %v2875_v28, %v3060_v8  ;;  %v3267_v8 = vld [vmem:[%s3081_s7 + $0x38] sm:$0xff]  }
  0xd7   : > { %4116 = vst [vmem:[#allocation18_spill] sm:$0xff] %v3124_v46  ;;  %2457 = vrcp.f32 %v3119_v44  ;;  %v3132_v2 = vpop.permute.xlu0 %962  ;;  %v1142_v24 = vmul.f32 %v2340_v40, %v1074_v53  ;;  %v1063_v53 = vsel %vm1053_vm2, %v1046_v32, %v959_v21  ;;  %v636_v21 = vpop.f32.mrf.mxu1  ;;  %v3213_v6 = vsel %vm1036_vm0, %v2916_v36, %v3066_v14 }
  0xd8   : > { %4117 = vst [vmem:[#allocation19_spill] sm:$0xff] %v3126_v48  ;;  %v3140_v48 = vld [vmem:[%s3081_s7 + $0x20] sm:$0xff]   ;;  %v3194_v40 = vpop.f32.mrf.mxu3  ;;  %v1246_v41 = vand.u32 2147483648, %v3119_v44  ;;  %v3220_v28 = vsel %vm1053_vm2, %v1044_v18, %v3068_v15  ;;  %v2339_v50 = vunpack.c.l.bf16 %v3122_v45  ;;  %v2336_v62 = vunpack.c.h.bf16 %v3088_v34 }
  0xd9   : > { %4118 = vst [vmem:[#allocation20_spill] sm:$0xff] %v3132_v2  ;;  %v2352_v3 = vunpack.c.h.bf16 %v3140_v48  ;;  %v533_v2 = vpop.f32.mrf.mxu0  ;;  %v3161_v37 = vadd.f32 %v1142_v24, %v1094_v10  ;;  %v1043_v10 = vsel %vm1036_vm0, %v2837_v20, %v3057_v7  ;;  %v814_v32 = vpop.f32.mrf.mxu2  ;;  %vm1240_vm4 = vweird.f32 %v3119_v44 }
  0xda   : > { %v3235_v15 = vsel %vm1053_vm2, %v1047_v19, %v3072_v17  ;;  %v1056_v45 = vsel %vm1053_vm2, %v1039_v29, %v3083_v26  ;;  %v3252_v17 = vld [vmem:[%s3081_s7 + $0x18] sm:$0xff]  }
  0xdb   : > { %v2273_v27 = vmul.f32 -1.442695, %v3161_v37 }
  0xdd   : > { %v3144_v46 = vpop.eup %2457  ;;  %2459 = vpow2.f32 %v2273_v27  ;;  %v1247_v27 = vor.u32 1.1754944e-38, %v1246_v41  ;;  %v2347_v41 = vunpack.c.l.bf16 %v3252_v17 }
  0xde   : > { %v1007_v42 = vpop.permute.xlu2 %1006  ;;  %v3163_v0 = vpop.permute.xlu1 %970  ;;  %v1236_v9 = vmul.f32 %v3144_v46, %v3119_v44  ;;  %vm1241_vm3 = vweird.f32 %v3144_v46  ;;  %2461 = vtanh.f32 %v3161_v37  ;;  %v1059_v37 = vsel %vm1053_vm2, %v3152_v59, %v3103_v49 }
  0xdf   : > { %v1080_v24 = vsel %vm1070_vm1, %v1063_v53, %v1007_v42  ;;  %v3181_v58 = vpop.permute.xlu0 %968  ;;  %v846_v42 = vadd.f32 %v809_v33, %v632_v23  ;;  %v1244_v33 = vand.u32 2147483647, %v3119_v44  ;;  %vm3247_vm5 = vmor %vm1240_vm4, %vm1241_vm3  ;;  %v638_v26 = vpop.f32.mrf.mxu1 }
  0xe0   : > { %v3192_v55 = vmul.f32 %v2352_v3, %v1080_v24  ;;  %v1237_v53 = vsub.f32 1.0, %v1236_v9  ;;  %v3208_v3 = vsel %vm1053_vm2, %v1041_v25, %v3062_v12  ;;  %v3225_v12 = vsel %vm1036_vm0, %v2923_v38, %v3070_v16 }
  0xe1   : > { %v535_v36 = vpop.f32.mrf.mxu0  ;;  %v845_v25 = vadd.f32 %v3109_v54, %v629_v35  ;;  %v1052_v38 = vsel %vm1036_vm0, %v2941_v43, %v3074_v22  ;;  %v1093_v9 = vadd.f32 %v3090_v39, %v846_v42  ;;  %v637_v24 = vadd.f32 %v636_v21, %v533_v2 }
  0xe2   : > { %v1238_v20 = vmul.f32 %v3144_v46, %v1237_v53  ;;  %v639_v42 = vadd.f32 %v638_v26, %v535_v36  ;;  %vm1245_vm6 = vcmp.eq.f32.partialorder %v1244_v33, 8.507059e+37  ;;  %v1060_v36 = vsel %vm1053_vm2, %v1043_v10, %v3100_v47  ;;  %v4121_v26 = vld [vmem:[#allocation18_spill] sm:$0xff] }
  0xe3   : > { %v2460_v35 = vpop.eup %2459  ;;  %v1092_v2 = vadd.f32 %v3090_v39, %v845_v25  ;;  %v848_v33 = vadd.f32 %v814_v32, %v637_v24  ;;  %v1077_v47 = vsel %vm1070_vm1, %v1060_v36, %v4121_v26  ;;  %v1069_v10 = vsel %vm1053_vm2, %v1052_v38, %v3163_v0  ;;  %v3286_v32 = vld [vmem:[%s3081_s7 + $0x30] sm:$0xff]   ;;  %v4123_v36 = vld [vmem:[#allocation15_spill] sm:$0xff] }
  0xe4   : > { %v1239_v23 = vadd.f32 %v3144_v46, %v1238_v20  ;;  %v3259_v20 = vpop.f32.mrf.mxu3  ;;  %v3262_v21 = vadd.f32 1.0, %v2460_v35  ;;  %v1145_v26 = vmul.f32 %v2347_v41, %v1077_v47  ;;  %v2348_v41 = vunpack.c.h.bf16 %v3252_v17 }
  0xe5   : > { %v1095_v35 = vadd.f32 %v3090_v39, %v848_v33  ;;  %v1062_v33 = vsel %vm1053_vm2, %v3170_v51, %v4123_v36 }
  0xe6   : > { %v3243_v54 = vpop.permute.xlu2 %1012  ;;  %v993_v34 = vpop.permute.xlu1 %992  ;;  %v1243_v29 = vsel %vm3247_vm5, %v3144_v46, %v1239_v23  ;;  %v2366_v46 = vld [vmem:[%s3081_s7 + $0x10] sm:$0xff]   ;;  %2463 = vrcp.f32 %v3262_v21  ;;  %v2364_v23 = vunpack.c.h.bf16 %v3267_v8  ;;  %vm1285_vm8 = vweird.f32 %v3262_v21 }
  0xe7   : > { %v1073_v18 = vsel %vm1070_vm1, %v1056_v45, %v993_v34  ;;  %v991_v43 = vpop.permute.xlu0 %990  ;;  %v816_v34 = vpop.f32.mrf.mxu2  ;;  %v3264_v22 = vsel %vm1245_vm6, %v1247_v27, %v1243_v29  ;;  %v2344_v44 = vunpack.c.h.bf16 %v2366_v46 }
  0xe8   : > { %v1141_v53 = vmul.f32 %v2339_v50, %v1073_v18  ;;  %v1072_v19 = vsel %vm1070_vm1, %v1055_v1, %v991_v43  ;;  %v849_v50 = vadd.f32 %v816_v34, %v639_v42  ;;  %1763 = vrot.lane.b32.xlu0 %v3264_v22, %s2649_s11  ;;  %v2343_v43 = vunpack.c.l.bf16 %v2366_v46  ;;  %v3292_v42 = vpop.eup %2461 }
  0xe9   : > { %v1140_v45 = vmul.f32 %v2336_v62, %v1072_v19  ;;  %v538_v18 = vpop.f32.mrf.mxu0  ;;  %v641_v19 = vpop.f32.mrf.mxu1 }
  0xea   : > { %v1157_v1 = vadd.f32 %v1141_v53, %v1093_v9  ;;  %v1096_v24 = vadd.f32 %v3090_v39, %v849_v50 }
  0xeb   : > { %v1156_v25 = vadd.f32 %v1140_v45, %v1092_v2  ;;  %v642_v45 = vadd.f32 %v641_v19, %v538_v18 }
  0xec   : > { %v2272_v62 = vmul.f32 -1.442695, %v1157_v1  ;;  %2465 = vtanh.f32 %v1157_v1  ;;  %v3298_v34 = vpop.f32.mrf.mxu3  ;;  %v3300_v46 = vpop.eup %2463  ;;  %v4122_v1 = vld [vmem:[#allocation12_spill] sm:$0xff] }
  0xed   : > { %v2271_v9 = vmul.f32 -1.442695, %v1156_v25  ;;  %2467 = vtanh.f32 %v1156_v25  ;;  %v3305_v50 = vsel %vm1053_vm2, %v3213_v6, %v4122_v1  ;;  %v2359_v25 = vunpack.c.l.bf16 %v3286_v32  ;;  %v2369_v1 = vld [vmem:[%s3081_s7 + $0x28] sm:$0xff]  }
  0xee   : > { %2469 = vpow2.f32 %v2272_v62  ;;  %v1019_v29 = vpop.permute.xlu2 %1018  ;;  %v999_v27 = vpop.permute.xlu1 %998  ;;  %v1281_v6 = vmul.f32 %v3300_v46, %v3262_v21  ;;  %vm1286_vm7 = vweird.f32 %v3300_v46 }
  0xef   : > { %2471 = vpow2.f32 %v2271_v9  ;;  %v1086_v49 = vsel %vm1070_vm1, %v1069_v10, %v1019_v29  ;;  %v1076_v59 = vsel %vm1070_vm1, %v1059_v37, %v999_v27  ;;  %v997_v53 = vpop.permute.xlu0 %996  ;;  %vm1287_vm9 = vmor %vm1285_vm8, %vm1286_vm7 }
  0xf0   : > { %v3294_v2 = vmul.f32 %v2364_v23, %v1086_v49  ;;  %v1144_v0 = vmul.f32 %v2344_v44, %v1076_v59  ;;  %v1075_v38 = vsel %vm1070_vm1, %v3208_v3, %v997_v53  ;;  %v819_v23 = vpop.f32.mrf.mxu2  ;;  %v4124_v3 = vld [vmem:[#allocation19_spill] sm:$0xff]  ;;  %1529 = vrot.lane.b32.xlu0 %v3292_v42, %s2648_s15  ;;  %v1282_v47 = vsub.f32 1.0, %v1281_v6 }
  0xf1   : > { %v1143_v62 = vmul.f32 %v2343_v43, %v1075_v38  ;;  %v1066_v18 = vsel %vm1053_vm2, %v3225_v12, %v4124_v3  ;;  %v850_v9 = vadd.f32 %v819_v23, %v642_v45  ;;  %v4125_v43 = vld [vmem:[#allocation20_spill] sm:$0xff]  ;;  %v2351_v12 = vunpack.c.l.bf16 %v3140_v48  ;;  %v643_v36 = vpop.f32.mrf.mxu1 }
  0xf2   : > { %v3311_v44 = vpop.eup %2465  ;;  %v3316_v37 = vadd.f32 %v1144_v0, %v1096_v24  ;;  %v3327_v10 = vsel %vm1053_vm2, %v3175_v11, %v4125_v43  ;;  %v540_v11 = vpop.f32.mrf.mxu0  ;;  %v3342_v59 = vsel %vm1053_vm2, %v3186_v30, %v3181_v58  ;;  %v1083_v48 = vsel %vm1070_vm1, %v1066_v18, %v3243_v54 }
  0xf3   : > { %v3322_v51 = vpop.eup %2467  ;;  %v3329_v29 = vadd.f32 %v1143_v62, %v1095_v35  ;;  %1527 = vrot.lane.b32.xlu2 %v3311_v44, %s2648_s15  ;;  %v1097_v49 = vadd.f32 %v3090_v39, %v850_v9  ;;  %v1283_v45 = vmul.f32 %v3300_v46, %v1282_v47  ;;  %v1289_v54 = vand.u32 2147483647, %v3262_v21  ;;  %v4126_v9 = vld [vmem:[#allocation13_spill] sm:$0xff] }
  0xf4   : > { %v2470_v24 = vpop.eup %2469  ;;  %v2275_v27 = vmul.f32 -1.442695, %v3316_v37  ;;  %1525 = vrot.lane.b32.xlu1 %v3322_v51, %s2648_s15  ;;  %v1291_v62 = vand.u32 2147483648, %v3262_v21  ;;  %v3360_v18 = vpop.f32.mrf.mxu3  ;;  %v657_v6 = vadd.f32 %v3194_v40, %v4126_v9  ;;  %v2356_v43 = vunpack.c.h.bf16 %v2369_v1 }
  0xf5   : > { %v2472_v35 = vpop.eup %2471  ;;  %v3346_v53 = vadd.f32 1.0, %v2470_v24  ;;  %v2274_v19 = vmul.f32 -1.442695, %v3329_v29  ;;  %v1161_v38 = vadd.f32 %v1145_v26, %v1097_v49  ;;  %vm1290_vm10 = vcmp.eq.f32.partialorder %v1289_v54, 8.507059e+37 }
  0xf6   : > { %v3349_v0 = vadd.f32 1.0, %v2472_v35  ;;  %2473 = vpow2.f32 %v2275_v27  ;;  %v1005_v17 = vpop.permute.xlu1 %1004  ;;  %v1284_v27 = vadd.f32 %v3300_v46, %v1283_v45  ;;  %v1292_v47 = vor.u32 1.1754944e-38, %v1291_v62 }
  0xf7   : > { %2475 = vrcp.f32 %v3346_v53  ;;  %v1079_v58 = vsel %vm1070_vm1, %v1062_v33, %v1005_v17  ;;  %v1003_v30 = vpop.permute.xlu0 %1002  ;;  %v2276_v23 = vmul.f32 -1.442695, %v1161_v38  ;;  %v644_v33 = vadd.f32 %v643_v36, %v540_v11 }
  0xf8   : > { %2477 = vrcp.f32 %v3349_v0  ;;  %v3358_v3 = vmul.f32 %v2351_v12, %v1079_v58  ;;  %v821_v26 = vpop.f32.mrf.mxu2  ;;  %v1078_v24 = vsel %vm1070_vm1, %v3220_v28, %v1003_v30  ;;  %v1151_v12 = vmul.f32 %v2359_v25, %v1083_v48  ;;  %v4127_v58 = vld [vmem:[#allocation14_spill] sm:$0xff] }
  0xf9   : > { %2479 = vpow2.f32 %v2274_v19  ;;  %v851_v49 = vadd.f32 %v821_v26, %v644_v33  ;;  %v2355_v35 = vunpack.c.l.bf16 %v2369_v1  ;;  %v3371_v40 = vadd.f32 %v3259_v20, %v4127_v58  ;;  %v646_v9 = vpop.f32.mrf.mxu1 }
  0xfa   : > { %2481 = vpow2.f32 %v2276_v23  ;;  %v1288_v11 = vsel %vm1287_vm9, %v3300_v46, %v1284_v27  ;;  %v543_v19 = vpop.f32.mrf.mxu0  ;;  %v2363_v28 = vunpack.c.l.bf16 %v3267_v8  ;;  %v1146_v21 = vmul.f32 %v2348_v41, %v1078_v24 }
  0xfb   : > { %v1098_v25 = vadd.f32 %v3090_v39, %v851_v49  ;;  %v3380_v48 = vsel %vm1290_vm10, %v1292_v47, %v1288_v11  ;;  %2483 = vtanh.f32 %v1161_v38  ;;  %v1274_v54 = vand.u32 2147483647, %v3346_v53 }
  0xfc   : > { %v2474_v17 = vpop.eup %2473  ;;  %1769 = vrot.lane.b32.xlu0 %v3380_v48, %s2649_s11  ;;  %v647_v49 = vadd.f32 %v646_v9, %v543_v19  ;;  %v834_v47 = vpop.f32.mrf.mxu3  ;;  %vm1270_vm11 = vweird.f32 %v3346_v53  ;;  %vm1255_vm12 = vweird.f32 %v3349_v0 }
  0xfd   : > { %v3375_v30 = vpop.eup %2475  ;;  %v3377_v45 = vadd.f32 1.0, %v2474_v17  ;;  %v3391_v41 = vadd.f32 %v1146_v21, %v1098_v25  ;;  %v1276_v21 = vand.u32 2147483648, %v3346_v53  ;;  %vm3412_vm13 = vcmp.eq.f32.partialorder %v1274_v54, 8.507059e+37 }
  0xfe   : > { %v3382_v1 = vpop.eup %2477  ;;  %v1011_v20 = vpop.permute.xlu1 %1010  ;;  %v1266_v36 = vmul.f32 %v3375_v30, %v3346_v53  ;;  %vm1271_vm14 = vweird.f32 %v3375_v30 }
  0xff   : > { %v2480_v62 = vpop.eup %2479  ;;  %2485 = vrcp.f32 %v3377_v45  ;;  %v1082_v23 = vsel %vm1070_vm1, %v3327_v10, %v1011_v20  ;;  %v1009_v38 = vpop.permute.xlu0 %1008  ;;  %v1251_v33 = vmul.f32 %v3382_v1, %v3349_v0  ;;  %v2277_v58 = vmul.f32 -1.442695, %v3391_v41  ;;  %vm3451_vm4 = vmor %vm1270_vm11, %vm1271_vm14 }
 0x100   : > { %v2482_v26 = vpop.eup %2481  ;;  %v3397_v24 = vmul.f32 %v2356_v43, %v1082_v23  ;;  %v1081_v27 = vsel %vm1070_vm1, %v3235_v15, %v1009_v38  ;;  %v824_v11 = vpop.f32.mrf.mxu2  ;;  %v856_v20 = vadd.f32 %v834_v47, %v657_v6  ;;  %v1267_v43 = vsub.f32 1.0, %v1266_v36 }
 0x101   : > { %v3402_v17 = vadd.f32 1.0, %v2482_v26  ;;  %v3405_v10 = vmul.f32 %v2355_v35, %v1081_v27  ;;  %v852_v25 = vadd.f32 %v824_v11, %v647_v49  ;;  %v3409_v23 = vadd.f32 1.0, %v2480_v62  ;;  %v3417_v38 = vpop.eup %2483 }
 0x102   : > { %v1252_v19 = vsub.f32 1.0, %v1251_v33  ;;  %v1259_v35 = vand.u32 2147483647, %v3349_v0  ;;  %v1103_v6 = vadd.f32 %v3090_v39, %v856_v20  ;;  %v545_v36 = vpop.f32.mrf.mxu0  ;;  %v1268_v62 = vmul.f32 %v3375_v30, %v1267_v43  ;;  %v648_v20 = vpop.f32.mrf.mxu1 }
 0x103   : > { %2487 = vrcp.f32 %v3402_v17  ;;  %v1099_v9 = vadd.f32 %v3090_v39, %v852_v25  ;;  %v1277_v54 = vor.u32 1.1754944e-38, %v1276_v21  ;;  %v1261_v33 = vand.u32 2147483648, %v3349_v0 }
 0x104   : > { %2489 = vpow2.f32 %v2277_v58  ;;  %v1253_v27 = vmul.f32 %v3382_v1, %v1252_v19  ;;  %v1167_v47 = vadd.f32 %v1151_v12, %v1103_v6  ;;  %1535 = vrot.lane.b32.xlu0 %v3417_v38, %s2648_s15  ;;  %v1269_v11 = vadd.f32 %v3375_v30, %v1268_v62  ;;  %v836_v6 = vpop.f32.mrf.mxu3 }
 0x105   : > { %v3422_v26 = vpop.eup %2485  ;;  %v3428_v49 = vadd.f32 %v3358_v3, %v1099_v9  ;;  %vm1256_vm15 = vweird.f32 %v3382_v1  ;;  %2491 = vrcp.f32 %v3409_v23  ;;  %vm3438_vm3 = vcmp.eq.f32.partialorder %v1259_v35, 8.507059e+37 }
 0x106   : > { %v1017_v58 = vpop.permute.xlu1 %1016  ;;  %v1254_v43 = vadd.f32 %v3382_v1, %v1253_v27  ;;  %v2282_v19 = vmul.f32 -1.442695, %v1167_v47  ;;  %v1311_v35 = vmul.f32 %v3422_v26, %v3377_v45  ;;  %2493 = vtanh.f32 %v1167_v47  ;;  %vm1257_vm5 = vmor %vm1255_vm12, %vm1256_vm15 }
 0x107   : > { %v1085_v21 = vsel %vm1070_vm1, %v3342_v59, %v1017_v58  ;;  %v1015_v25 = vpop.permute.xlu0 %1014  ;;  %v2278_v12 = vmul.f32 -1.442695, %v3428_v49  ;;  %v857_v58 = vadd.f32 %v836_v6, %v3371_v40  ;;  %v1262_v46 = vor.u32 1.1754944e-38, %v1261_v33 }
 0x108   : > { %v3445_v9 = vmul.f32 %v2363_v28, %v1085_v21  ;;  %v1084_v8 = vsel %vm1070_vm1, %v3305_v50, %v1015_v25  ;;  %v649_v28 = vadd.f32 %v648_v20, %v545_v36  ;;  %v826_v27 = vpop.f32.mrf.mxu2  ;;  %v1273_v21 = vsel %vm3451_vm4, %v3375_v30, %v1269_v11 }
 0x109   : > { %v3457_v62 = vpop.eup %2487  ;;  %2495 = vpow2.f32 %v2278_v12  ;;  %v1258_v47 = vsel %vm1257_vm5, %v3382_v1, %v1254_v43  ;;  %v4134_v50 = vunpack.c.h.bf16 %v3286_v32  ;;  %v1104_v40 = vadd.f32 %v3090_v39, %v857_v58 }
 0x10a   : > { %v2490_v53 = vpop.eup %2489  ;;  %2497 = vpow2.f32 %v2282_v19  ;;  %v853_v25 = vadd.f32 %v826_v27, %v649_v28  ;;  %v3476_v0 = vsel %vm3412_vm13, %v1277_v54, %v1273_v21  ;;  %v3480_v20 = vsel %vm3438_vm3, %v1262_v46, %v1258_v47  ;;  %v548_v30 = vpop.f32.mrf.mxu0  ;;  %v4135_v46 = vld [vmem:[#allocation16_spill] sm:$0xff] }
 0x10b   : > { %v1152_v36 = vmul.f32 %v4134_v50, %v1084_v8  ;;  %2499 = vtanh.f32 %v3316_v37  ;;  %v1326_v1 = vmul.f32 %v3457_v62, %v3402_v17  ;;  %v3484_v33 = vpop.eup %2491  ;;  %v3486_v32 = vadd.f32 1.0, %v2490_v53  ;;  %1767 = vrot.lane.b32.xlu2 %v3476_v0, %s2649_s11  ;;  %1765 = vrot.lane.b32.xlu1 %v3480_v20, %s2649_s11  ;;  %v651_v6 = vpop.f32.mrf.mxu1 }
 0x10c   : > { %v1100_v11 = vadd.f32 %v3090_v39, %v853_v25  ;;  %v1312_v37 = vsub.f32 1.0, %v1311_v35  ;;  %2501 = vtanh.f32 %v3329_v29  ;;  %v662_v15 = vadd.f32 %v3298_v34, %v4135_v46  ;;  %v3500_v12 = vpop.eup %2493  ;;  %v839_v34 = vpop.f32.mrf.mxu3 }
 0x10d   : > { %v3489_v43 = vadd.f32 %v1152_v36, %v1104_v40  ;;  %v664_v54 = vadd.f32 %v3360_v18, %v3136_v31  ;;  %v1327_v3 = vsub.f32 1.0, %v1326_v1  ;;  %vm1330_vm6 = vweird.f32 %v3402_v17  ;;  %1547 = vrot.lane.b32.xlu0 %v3500_v12, %s2648_s15 }
 0x10e   : > { %v1164_v19 = vadd.f32 %v3192_v55, %v1100_v11  ;;  %v1334_v59 = vand.u32 2147483647, %v3402_v17  ;;  %v1313_v35 = vmul.f32 %v3422_v26, %v1312_v37  ;;  %v652_v29 = vadd.f32 %v651_v6, %v548_v30 }
 0x10f   : > { %v2496_v8 = vpop.eup %2495  ;;  %v1328_v31 = vmul.f32 %v3457_v62, %v1327_v3  ;;  %vm1331_vm7 = vweird.f32 %v3457_v62  ;;  %v1336_v18 = vand.u32 2147483648, %v3402_v17  ;;  %2503 = vrcp.f32 %v3486_v32 }
 0x110   : > { %v2498_v55 = vpop.eup %2497  ;;  %v2279_v28 = vmul.f32 -1.442695, %v1164_v19  ;;  %v829_v27 = vpop.f32.mrf.mxu2  ;;  %v858_v58 = vadd.f32 %v839_v34, %v662_v15  ;;  %vm1315_vm8 = vweird.f32 %v3377_v45  ;;  %vm1316_vm9 = vweird.f32 %v3422_v26  ;;  %vm3526_vm10 = vmor %vm1330_vm6, %vm1331_vm7 }
 0x111   : > { %v3513_v53 = vpop.eup %2499  ;;  %v3515_v21 = vadd.f32 1.0, %v2498_v55  ;;  %v854_v47 = vadd.f32 %v829_v27, %v652_v29  ;;  %v1329_v50 = vadd.f32 %v3457_v62, %v1328_v31  ;;  %v3519_v36 = vadd.f32 1.0, %v2496_v8  ;;  %vm3554_vm12 = vmor %vm1315_vm8, %vm1316_vm9 }
 0x112   : > { %v1105_v25 = vadd.f32 %v3090_v39, %v858_v58  ;;  %v1314_v30 = vadd.f32 %v3422_v26, %v1313_v35  ;;  %v1296_v1 = vmul.f32 %v3484_v33, %v3409_v23  ;;  %v3533_v11 = vpop.eup %2501  ;;  %v1337_v46 = vor.u32 1.1754944e-38, %v1336_v18  ;;  %v550_v6 = vpop.f32.mrf.mxu0 }
 0x113   : > { %2505 = vrcp.f32 %v3515_v21  ;;  %v1333_v37 = vsel %vm3526_vm10, %v3457_v62, %v1329_v50  ;;  %v1319_v17 = vand.u32 2147483647, %v3377_v45  ;;  %v2283_v15 = vmul.f32 -1.442695, %v3489_v43  ;;  %1533 = vrot.lane.b32.xlu2 %v3513_v53, %s2648_s15  ;;  %1531 = vrot.lane.b32.xlu1 %v3533_v11, %s2648_s15  ;;  %v653_v34 = vpop.f32.mrf.mxu1 }
 0x114   : > { %2507 = vpow2.f32 %v2279_v28  ;;  %v3542_v3 = vadd.f32 %v3445_v9, %v1105_v25  ;;  %v1321_v35 = vand.u32 2147483648, %v3377_v45  ;;  %v1101_v62 = vadd.f32 %v3090_v39, %v854_v47  ;;  %v841_v45 = vpop.f32.mrf.mxu3 }
 0x115   : > { %2509 = vtanh.f32 %v1164_v19  ;;  %vm1335_vm11 = vcmp.eq.f32.partialorder %v1334_v59, 8.507059e+37  ;;  %v1297_v8 = vsub.f32 1.0, %v1296_v1  ;;  %v3558_v29 = vpop.eup %2503  ;;  %v1318_v19 = vsel %vm3554_vm12, %v3422_v26, %v1314_v30 }
 0x116   : > { %2511 = vrcp.f32 %v3519_v36  ;;  %v3561_v31 = vsel %vm1335_vm11, %v1337_v46, %v1333_v37  ;;  %v1306_v59 = vand.u32 2147483648, %v3409_v23  ;;  %v654_v18 = vadd.f32 %v653_v34, %v550_v6 }
 0x117   : > { %1775 = vrot.lane.b32.xlu0 %v3561_v31, %s2649_s11  ;;  %v1298_v55 = vmul.f32 %v3484_v33, %v1297_v8  ;;  %vm1301_vm13 = vweird.f32 %v3484_v33  ;;  %v1304_v28 = vand.u32 2147483647, %v3409_v23  ;;  %2513 = vpow2.f32 %v2283_v15 }
 0x118   : > { %v831_v27 = vpop.f32.mrf.mxu2  ;;  %v859_v58 = vadd.f32 %v841_v45, %v664_v54  ;;  %vm1320_vm14 = vcmp.eq.f32.partialorder %v1319_v17, 8.507059e+37  ;;  %v1322_v47 = vor.u32 1.1754944e-38, %v1321_v35  ;;  %v3573_v26 = vadd.f32 %v3405_v10, %v1101_v62 }
 0x119   : > { %v2506_v50 = vpop.eup %2505  ;;  %v855_v25 = vadd.f32 %v831_v27, %v654_v18  ;;  %v1299_v40 = vadd.f32 %v3484_v33, %v1298_v55  ;;  %vm1300_vm15 = vweird.f32 %v3409_v23  ;;  %v1307_v54 = vor.u32 1.1754944e-38, %v1306_v59 }
 0x11a   : > { %v2508_v30 = vpop.eup %2507  ;;  %v1106_v1 = vadd.f32 %v3090_v39, %v859_v58  ;;  %v3578_v37 = vsel %vm1320_vm14, %v1322_v47, %v1318_v19  ;;  %vm1302_vm3 = vmor %vm1300_vm15, %vm1301_vm13  ;;  %v1416_v46 = vmul.f32 %v2506_v50, %v3515_v21  ;;  %vm1305_vm4 = vcmp.eq.f32.partialorder %v1304_v28, 8.507059e+37 }
 0x11b   : > { %v3583_v17 = vpop.eup %2509  ;;  %v3585_v10 = vadd.f32 1.0, %v2508_v30  ;;  %v1102_v15 = vadd.f32 %v3090_v39, %v855_v25  ;;  %v1303_v6 = vsel %vm1302_vm3, %v3484_v33, %v1299_v40  ;;  %2515 = vtanh.f32 %v3428_v49  ;;  %1773 = vrot.lane.b32.xlu2 %v3578_v37, %s2649_s11 }
 0x11c   : > { %v3589_v23 = vpop.eup %2511  ;;  %v3593_v35 = vadd.f32 %v3294_v2, %v1106_v1  ;;  %v3597_v62 = vsel %vm1305_vm4, %v1307_v54, %v1303_v6  ;;  %v1417_v9 = vsub.f32 1.0, %v1416_v46  ;;  %v2280_v2 = vmul.f32 -1.442695, %v3573_v26 }
 0x11d   : > { %2517 = vrcp.f32 %v3585_v10  ;;  %v3601_v39 = vadd.f32 %v3397_v24, %v1102_v15  ;;  %1771 = vrot.lane.b32.xlu1 %v3597_v62, %s2649_s11  ;;  %v2514_v33 = vpop.eup %2513  ;;  %vm1421_vm5 = vweird.f32 %v2506_v50  ;;  %v1426_v19 = vand.u32 2147483648, %v3515_v21 }
 0x11e   : > { %2519 = vtanh.f32 %v3391_v41  ;;  %v1418_v49 = vmul.f32 %v2506_v50, %v1417_v9  ;;  %v1356_v24 = vmul.f32 %v3589_v23, %v3519_v36  ;;  %vm1420_vm6 = vweird.f32 %v3515_v21 }
 0x11f   : > { %v2281_v8 = vmul.f32 -1.442695, %v3601_v39  ;;  %1541 = vrot.lane.b32.xlu0 %v3583_v17, %s2648_s15  ;;  %v1424_v59 = vand.u32 2147483647, %v3515_v21  ;;  %2521 = vpow2.f32 %v2280_v2  ;;  %vm3617_vm7 = vmor %vm1420_vm6, %vm1421_vm5  ;;  %v3623_v55 = vadd.f32 1.0, %v2514_v33 }
 0x120   : > { %v1419_v34 = vadd.f32 %v2506_v50, %v1418_v49  ;;  %v1341_v27 = vmul.f32 %v3558_v29, %v3486_v32  ;;  %v1427_v21 = vor.u32 1.1754944e-38, %v1426_v19  ;;  %v1357_v47 = vsub.f32 1.0, %v1356_v24 }
 0x121   : > { %v3615_v41 = vpop.eup %2515  ;;  %2523 = vpow2.f32 %v2281_v8  ;;  %vm1425_vm8 = vcmp.eq.f32.partialorder %v1424_v59, 8.507059e+37  ;;  %vm1361_vm9 = vweird.f32 %v3589_v23  ;;  %v1366_v8 = vand.u32 2147483648, %v3519_v36 }
 0x122   : > { %v1423_v28 = vsel %vm3617_vm7, %v2506_v50, %v1419_v34  ;;  %2525 = vtanh.f32 %v3542_v3  ;;  %v1342_v25 = vsub.f32 1.0, %v1341_v27  ;;  %v1358_v1 = vmul.f32 %v3589_v23, %v1357_v47 }
 0x123   : > { %v3621_v45 = vpop.eup %2517  ;;  %1539 = vrot.lane.b32.xlu2 %v3615_v41, %s2648_s15  ;;  %2527 = vtanh.f32 %v3489_v43  ;;  %v3639_v40 = vsel %vm1425_vm8, %v1427_v21, %v1423_v28  ;;  %vm1346_vm10 = vweird.f32 %v3558_v29  ;;  %vm1360_vm11 = vweird.f32 %v3519_v36 }
 0x124   : > { %v3629_v58 = vpop.eup %2519  ;;  %v1371_v50 = vmul.f32 %v3621_v45, %v3585_v10  ;;  %2529 = vrcp.f32 %v3623_v55  ;;  %v1343_v15 = vmul.f32 %v3558_v29, %v1342_v25  ;;  %v1359_v49 = vadd.f32 %v3589_v23, %v1358_v1  ;;  %vm3675_vm12 = vmor %vm1360_vm11, %vm1361_vm9 }
 0x125   : > { %1537 = vrot.lane.b32.xlu1 %v3629_v58, %s2648_s15  ;;  %v2522_v30 = vpop.eup %2521  ;;  %2531 = vtanh.f32 %v3593_v35  ;;  %v1364_v59 = vand.u32 2147483647, %v3519_v36  ;;  %v1351_v18 = vand.u32 2147483648, %v3486_v32  ;;  %vm1345_vm13 = vweird.f32 %v3486_v32 }
 0x126   : > { %v1372_v54 = vsub.f32 1.0, %v1371_v50  ;;  %v3651_v43 = vadd.f32 1.0, %v2522_v30  ;;  %v1344_v19 = vadd.f32 %v3558_v29, %v1343_v15  ;;  %v1349_v27 = vand.u32 2147483647, %v3486_v32  ;;  %vm3687_vm15 = vmor %vm1345_vm13, %vm1346_vm10 }
 0x127   : > { %1787 = vrot.lane.b32.xlu0 %v3639_v40, %s2649_s11  ;;  %v2524_v46 = vpop.eup %2523  ;;  %vm1376_vm14 = vweird.f32 %v3621_v45  ;;  %v1363_v36 = vsel %vm3675_vm12, %v3589_v23, %v1359_v49  ;;  %v1367_v47 = vor.u32 1.1754944e-38, %v1366_v8  ;;  %v1381_v50 = vand.u32 2147483648, %v3585_v10 }
 0x128   : > { %v3647_v6 = vadd.f32 1.0, %v2524_v46  ;;  %v3649_v9 = vpop.eup %2525  ;;  %v1373_v33 = vmul.f32 %v3621_v45, %v1372_v54  ;;  %v1348_v32 = vsel %vm3687_vm15, %v3558_v29, %v1344_v19  ;;  %vm1375_vm3 = vweird.f32 %v3585_v10 }
 0x129   : > { %4142 = vst [vmem:[#allocation18_spill] sm:$0xff] %v3649_v9  ;;  %v3654_v2 = vpop.eup %2527  ;;  %v1379_v30 = vand.u32 2147483647, %v3585_v10  ;;  %vm1365_vm4 = vcmp.eq.f32.partialorder %v1364_v59, 8.507059e+37  ;;  %v1352_v23 = vor.u32 1.1754944e-38, %v1351_v18  ;;  %vm3699_vm5 = vmor %vm1375_vm3, %vm1376_vm14  ;;  %vm1350_vm6 = vcmp.eq.f32.partialorder %v1349_v27, 8.507059e+37 }
 0x12a   : > { %4143 = vst [vmem:[#allocation12_spill] sm:$0xff] %v3654_v2  ;;  %2533 = vrcp.f32 %v3647_v6  ;;  %v3662_v34 = vpop.eup %2529  ;;  %v1374_v21 = vadd.f32 %v3621_v45, %v1373_v33  ;;  %v3703_v15 = vsel %vm1365_vm4, %v1367_v47, %v1363_v36  ;;  %v1382_v49 = vor.u32 1.1754944e-38, %v1381_v50 }
 0x12b   : > { %1551 = vrot.lane.b32.xlu2 %v3649_v9, %s2648_s15  ;;  %v3668_v24 = vpop.eup %2531  ;;  %2535 = vrcp.f32 %v3651_v43  ;;  %v1431_v1 = vmul.f32 %v3662_v34, %v3623_v55  ;;  %v3711_v10 = vsel %vm1350_vm6, %v1352_v23, %v1348_v32  ;;  %vm1380_vm7 = vcmp.eq.f32.partialorder %v1379_v30, 8.507059e+37 }
 0x12c   : > { %4144 = vst [vmem:[#allocation15_spill] sm:$0xff] %v3668_v24  ;;  %v1378_v29 = vsel %vm3699_vm5, %v3621_v45, %v1374_v21  ;;  %2537 = vtanh.f32 %v3601_v39  ;;  %vm1436_vm9 = vweird.f32 %v3662_v34  ;;  %vm1405_vm10 = vweird.f32 %v3647_v6 }
 0x12d   : > { %1549 = vrot.lane.b32.xlu1 %v3654_v2, %s2648_s15  ;;  %v1432_v19 = vsub.f32 1.0, %v1431_v1  ;;  %2539 = vtanh.f32 %v3573_v26  ;;  %v3717_v45 = vsel %vm1380_vm7, %v1382_v49, %v1378_v29  ;;  %v1411_v26 = vand.u32 2147483648, %v3647_v6 }
 0x12e   : > { %v1409_v50 = vand.u32 2147483647, %v3647_v6  ;;  %v1441_v32 = vand.u32 2147483648, %v3623_v55  ;;  %vm1435_vm12 = vweird.f32 %v3623_v55  ;;  %v1439_v30 = vand.u32 2147483647, %v3623_v55 }
 0x12f   : > { %1553 = vrot.lane.b32.xlu0 %v3668_v24, %s2648_s15  ;;  %v1433_v28 = vmul.f32 %v3662_v34, %v1432_v19  ;;  %vm1437_vm13 = vmor %vm1435_vm12, %vm1436_vm9  ;;  %v1412_v23 = vor.u32 1.1754944e-38, %v1411_v26  ;;  %vm1390_vm4 = vweird.f32 %v3651_v43  ;;  %v4154_v24 = vld [vmem:[#allocation9_spill] sm:$0xff] }
 0x130   : > { %v2534_v54 = vpop.eup %2533  ;;  %vm1410_vm14 = vcmp.eq.f32.partialorder %v1409_v50, 8.507059e+37  ;;  %vm1440_vm15 = vcmp.eq.f32.partialorder %v1439_v30, 8.507059e+37 }
 0x131   : > { %v1401_v33 = vmul.f32 %v2534_v54, %v3647_v6  ;;  %v2536_v59 = vpop.eup %2535  ;;  %vm1406_vm8 = vweird.f32 %v2534_v54  ;;  %v1434_v47 = vadd.f32 %v3662_v34, %v1433_v28 }
 0x132   : > { %v1386_v27 = vmul.f32 %v2536_v59, %v3651_v43  ;;  %v3723_v39 = vpop.eup %2537  ;;  %vm1407_vm11 = vmor %vm1405_vm10, %vm1406_vm8  ;;  %vm1391_vm3 = vweird.f32 %v2536_v59 }
 0x133   : > { %1779 = vrot.lane.b32.xlu2 %v3703_v15, %s2649_s11  ;;  %v1402_v8 = vsub.f32 1.0, %v1401_v33  ;;  %4151 = vst [vmem:[#allocation19_spill] sm:$0xff] %v3723_v39  ;;  %v3725_v21 = vpop.eup %2539  ;;  %v1438_v46 = vsel %vm1437_vm13, %v3662_v34, %v1434_v47  ;;  %v1442_v33 = vor.u32 1.1754944e-38, %v1441_v32  ;;  %v1394_v34 = vand.u32 2147483647, %v3651_v43  ;;  %vm1392_vm5 = vmor %vm1390_vm4, %vm1391_vm3 }
 0x134   : > { %v1387_v25 = vsub.f32 1.0, %v1386_v27 }
 0x135   : > { %1777 = vrot.lane.b32.xlu1 %v3711_v10, %s2649_s11  ;;  %v1403_v18 = vmul.f32 %v2534_v54, %v1402_v8  ;;  %v3744_v6 = vsel %vm1440_vm15, %v1442_v33, %v1438_v46  ;;  %vm1395_vm6 = vcmp.eq.f32.partialorder %v1394_v34, 8.507059e+37 }
 0x136   : > { %v1388_v29 = vmul.f32 %v2536_v59, %v1387_v25 }
 0x137   : > { %1781 = vrot.lane.b32.xlu0 %v3717_v45, %s2649_s11  ;;  %v1404_v36 = vadd.f32 %v2534_v54, %v1403_v18 }
 0x138   : > { %v1389_v55 = vadd.f32 %v2536_v59, %v1388_v29 }
 0x139   : > { %v1408_v1 = vsel %vm1407_vm11, %v2534_v54, %v1404_v36  ;;  %v1396_v54 = vand.u32 2147483648, %v3651_v43  ;;  %v2284_v43 = vmul.f32 -1.442695, %v3542_v3 }
 0x13a   : > { %v3740_v49 = vsel %vm1410_vm14, %v1412_v23, %v1408_v1  ;;  %v1393_v8 = vsel %vm1392_vm5, %v2536_v59, %v1389_v55 }
 0x13b   : > { %1545 = vrot.lane.b32.xlu2 %v3723_v39, %s2648_s15  ;;  %v1397_v19 = vor.u32 1.1754944e-38, %v1396_v54  ;;  %2541 = vpow2.f32 %v2284_v43  ;;  %v2285_v54 = vmul.f32 -1.442695, %v3593_v35 }
 0x13d   : > { %1543 = vrot.lane.b32.xlu1 %v3725_v21, %s2648_s15  ;;  %v3751_v18 = vsel %vm1395_vm6, %v1397_v19, %v1393_v8 }
 0x141   : > { %v2542_v47 = vpop.eup %2541 }
 0x142   : > { %v1233_v30 = vadd.f32 1.0, %v2542_v47 }
 0x143   : > { %1785 = vrot.lane.b32.xlu2 %v3740_v49, %s2649_s11 }
 0x144   : > { %2543 = vrcp.f32 %v1233_v30  ;;  %vm1450_vm8 = vweird.f32 %v1233_v30 }
 0x145   : > { %1789 = vrot.lane.b32.xlu1 %v3744_v6, %s2649_s11  ;;  %v1524_v36 = vpop.permute.xlu0 %1523  ;;  %2545 = vpow2.f32 %v2285_v54 }
 0x146   : > { %v1571_v26 = vmul.f32 %v1524_v36, %v3264_v22 }
 0x14a   : > { %v2544_v33 = vpop.eup %2543 }
 0x14b   : > { %v1446_v55 = vmul.f32 %v2544_v33, %v1233_v30  ;;  %v2546_v36 = vpop.eup %2545  ;;  %vm1451_vm7 = vweird.f32 %v2544_v33 }
 0x14c   : > { %v1234_v35 = vadd.f32 1.0, %v2546_v36  ;;  %vm1452_vm9 = vmor %vm1450_vm8, %vm1451_vm7 }
 0x14d   : > { %v1528_v28 = vpop.permute.xlu2 %1527  ;;  %1783 = vrot.lane.b32.xlu1 %v3751_v18, %s2649_s11  ;;  %v1447_v19 = vsub.f32 1.0, %v1446_v55 }
 0x14e   : > { %v1573_v27 = vmul.f32 %v1528_v28, %v3476_v0  ;;  %2547 = vrcp.f32 %v1234_v35  ;;  %vm1465_vm12 = vweird.f32 %v1234_v35 }
 0x150   : > { %1607 = vrot.lane.b32.xlu0 %v1573_v27, %s2648_s15  ;;  %v1448_v27 = vmul.f32 %v2544_v33, %v1447_v19 }
 0x155   : > { %1603 = vrot.lane.b32.xlu1 %v1571_v26, %s2648_s15 }
 0x15a   : > { %v3760_v59 = vpop.permute.xlu0 %1763 }
 0x162   : > { %v1530_v25 = vpop.permute.xlu0 %1529 }
 0x163   : > { %v1574_v50 = vmul.f32 %v1530_v25, %v3380_v48  ;;  %v1449_v25 = vadd.f32 %v2544_v33, %v1448_v27 }
 0x165   : > { %v3763_v1 = vpop.permute.xlu2 %1767  ;;  %1609 = vrot.lane.b32.xlu1 %v1574_v50, %s2648_s15  ;;  %v1456_v50 = vand.u32 2147483648, %v1233_v30 }
 0x166   : > { %v1526_v32 = vpop.permute.xlu1 %1525 }
 0x167   : > { %v1572_v23 = vmul.f32 %v1526_v32, %v3480_v20  ;;  %v1457_v55 = vor.u32 1.1754944e-38, %v1456_v50 }
 0x169   : > { %1605 = vrot.lane.b32.xlu2 %v1572_v23, %s2648_s15  ;;  %v1454_v23 = vand.u32 2147483647, %v1233_v30 }
 0x16b   : > { %vm1455_vm10 = vcmp.eq.f32.partialorder %v1454_v23, 8.507059e+37 }
 0x16d   : > { %v1534_v46 = vpop.permute.xlu2 %1533 }
 0x16e   : > { %v1576_v3 = vmul.f32 %v1534_v46, %v3578_v37  ;;  %v3769_v29 = vpop.permute.xlu0 %1769 }
 0x170   : > { %1613 = vrot.lane.b32.xlu0 %v1576_v3, %s2648_s15  ;;  %v1453_v3 = vsel %vm1452_vm9, %v2544_v33, %v1449_v25  ;;  %v2548_v33 = vpop.eup %2547 }
 0x171   : > { %v3783_v54 = vsel %vm1455_vm10, %v1457_v55, %v1453_v3  ;;  %vm1466_vm11 = vweird.f32 %v2548_v33 }
 0x172   : > { %vm1467_vm13 = vmor %vm1465_vm12, %vm1466_vm11 }
 0x175   : > { %v3773_v34 = vpop.permute.xlu2 %1773 }
 0x176   : > { %v1536_v8 = vpop.permute.xlu0 %1535 }
 0x177   : > { %v1577_v28 = vmul.f32 %v1536_v8, %v3561_v31 }
 0x179   : > { %1615 = vrot.lane.b32.xlu1 %v1577_v28, %s2648_s15 }
 0x17d   : > { %v1540_v26 = vpop.permute.xlu2 %1539  ;;  %v3777_v43 = vpop.permute.xlu1 %1765 }
 0x17e   : > { %v1579_v47 = vmul.f32 %v1540_v26, %v3703_v15  ;;  %v1461_v26 = vmul.f32 %v2548_v33, %v1234_v35 }
 0x17f   : > { %v1548_v32 = vpop.permute.xlu0 %1547 }
 0x180   : > { %1619 = vrot.lane.b32.xlu0 %v1579_v47, %s2648_s15  ;;  %v1583_v46 = vmul.f32 %v1548_v32, %v3639_v40  ;;  %v1462_v32 = vsub.f32 1.0, %v1461_v26  ;;  %v1469_v26 = vand.u32 2147483647, %v1234_v35 }
 0x182   : > { %1627 = vrot.lane.b32.xlu1 %v1583_v46, %s2648_s15  ;;  %v1463_v46 = vmul.f32 %v2548_v33, %v1462_v32  ;;  %vm1470_vm14 = vcmp.eq.f32.partialorder %v1469_v26, 8.507059e+37 }
 0x185   : > { %v1552_v8 = vpop.permute.xlu2 %1551  ;;  %v1532_v19 = vpop.permute.xlu1 %1531 }
 0x186   : > { %v1585_v28 = vmul.f32 %v1552_v8, %v3783_v54  ;;  %v1575_v27 = vmul.f32 %v1532_v19, %v3597_v62 }
 0x188   : > { %1611 = vrot.lane.b32.xlu2 %v1575_v27, %s2648_s15  ;;  %1631 = vrot.lane.b32.xlu0 %v1585_v28, %s2648_s15  ;;  %v1464_v28 = vadd.f32 %v2548_v33, %v1463_v46  ;;  %v1471_v27 = vand.u32 2147483648, %v1234_v35 }
 0x189   : > { %v3789_v30 = vpop.permute.xlu0 %1775 }
 0x18a   : > { %v1472_v32 = vor.u32 1.1754944e-38, %v1471_v27 }
 0x18d   : > { %v3791_v36 = vpop.permute.xlu2 %1779 }
 0x18f   : > { %v3793_v47 = vpop.permute.xlu1 %1771 }
 0x191   : > { %v1542_v25 = vpop.permute.xlu0 %1541 }
 0x192   : > { %v1580_v50 = vmul.f32 %v1542_v25, %v3717_v45  ;;  %v1468_v25 = vsel %vm1467_vm13, %v2548_v33, %v1464_v28 }
 0x193   : > { %v3804_v9 = vsel %vm1470_vm14, %v1472_v32, %v1468_v25  ;;  %v1493_v25 = vmul.f32 %v3476_v0, %v3035_v61  ;;  %v1494_v61 = vmul.f32 %v3380_v48, %v4154_v24  ;;  %v1497_v24 = vmul.f32 %v3561_v31, %v3057_v7 }
 0x194   : > { %1621 = vrot.lane.b32.xlu1 %v1580_v50, %s2648_s15 }
 0x195   : > { %v1546_v23 = vpop.permute.xlu2 %1545 }
 0x196   : > { %v1582_v3 = vmul.f32 %v1546_v23, %v3740_v49 }
 0x197   : > { %v1538_v55 = vpop.permute.xlu1 %1537 }
 0x198   : > { %v1578_v8 = vmul.f32 %v1538_v55, %v3711_v10  ;;  %1625 = vrot.lane.b32.xlu0 %v1582_v3, %s2648_s15 }
 0x199   : > { %v3800_v19 = vpop.permute.xlu0 %1787 }
 0x19a   : > { %1617 = vrot.lane.b32.xlu2 %v1578_v8, %s2648_s15 }
 0x19d   : > { %v3817_v27 = vpop.permute.xlu2 %1785 }
 0x19e   : > { %4152 = vst [vmem:[#allocation20_spill] sm:$0xff] %v3817_v27 }
 0x19f   : > { %v1550_v50 = vpop.permute.xlu1 %1549 }
 0x1a0   : > { %v1584_v23 = vmul.f32 %v1550_v50, %v3744_v6  ;;  %v1492_v50 = vmul.f32 %v3480_v20, %v3049_v4 }
 0x1a1   : > { %v1554_v55 = vpop.permute.xlu0 %1553 }
 0x1a2   : > { %1629 = vrot.lane.b32.xlu2 %v1584_v23, %s2648_s15  ;;  %v1586_v3 = vmul.f32 %v1554_v55, %v3804_v9 }
 0x1a4   : > { %1633 = vrot.lane.b32.xlu1 %v1586_v3, %s2648_s15 }
 0x1a7   : > { %v3809_v46 = vpop.permute.xlu1 %1777 }
 0x1a9   : > { %v3815_v28 = vpop.permute.xlu0 %1781 }
 0x1af   : > { %v1544_v8 = vpop.permute.xlu1 %1543 }
 0x1b0   : > { %v1581_v35 = vmul.f32 %v1544_v8, %v3751_v18  ;;  %v4153_v8 = vld [vmem:[#allocation8_spill] sm:$0xff] }
 0x1b2   : > { %1623 = vrot.lane.b32.xlu2 %v1581_v35, %s2648_s15  ;;  %v1491_v35 = vmul.f32 %v3264_v22, %v4153_v8 }
 0x1b7   : > { %v3813_v33 = vpop.permute.xlu1 %1789 }
 0x1bf   : > { %v3819_v26 = vpop.permute.xlu1 %1783 }
 0x1c2   : > { %v1608_v32 = vpop.permute.xlu0 %1607 }
 0x1c3   : > { %v1606_v23 = vpop.permute.xlu2 %1605  ;;  %v1653_v55 = vadd.f32 %v1608_v32, %v1493_v25  ;;  %v1495_v25 = vmul.f32 %v3597_v62, %v3003_v52  ;;  %v1499_v52 = vmul.f32 %v3703_v15, %v3023_v57  ;;  %v1505_v57 = vmul.f32 %v3783_v54, %v3045_v63 }
 0x1c4   : > { %v1652_v3 = vadd.f32 %v1606_v23, %v1492_v50  ;;  %v1496_v50 = vmul.f32 %v3578_v37, %v3015_v56  ;;  %v1498_v56 = vmul.f32 %v3711_v10, %v3053_v5  ;;  %v1504_v5 = vmul.f32 %v3744_v6, %v3066_v14 }
 0x1c5   : > { %1687 = vrot.lane.b32.xlu1 %v1653_v55, %s2648_s15  ;;  %v1502_v63 = vmul.f32 %v3740_v49, %v3033_v60 }
 0x1c6   : > { %1685 = vrot.lane.b32.xlu0 %v1652_v3, %s2648_s15 }
 0x1c7   : > { %v1604_v39 = vpop.permute.xlu1 %1603 }
 0x1c8   : > { %v1651_v27 = vadd.f32 %v1604_v39, %v1491_v35 }
 0x1ca   : > { %1683 = vrot.lane.b32.xlu2 %v1651_v27, %s2648_s15 }
 0x1d7   : > { %v1610_v2 = vpop.permute.xlu1 %1609 }
 0x1d8   : > { %v1654_v4 = vadd.f32 %v1610_v2, %v1494_v61 }
 0x1da   : > { %1689 = vrot.lane.b32.xlu2 %v1654_v4, %s2648_s15  ;;  %v1503_v4 = vmul.f32 %v3639_v40, %v3070_v16  ;;  %v1500_v16 = vmul.f32 %v3717_v45, %v3064_v13 }
 0x1e2   : > { %v1612_v32 = vpop.permute.xlu2 %1611  ;;  %v1614_v23 = vpop.permute.xlu0 %1613 }
 0x1e3   : > { %v1655_v55 = vadd.f32 %v1612_v32, %v1495_v25  ;;  %v1656_v3 = vadd.f32 %v1614_v23, %v1496_v50 }
 0x1e5   : > { %1691 = vrot.lane.b32.xlu0 %v1655_v55, %s2648_s15  ;;  %1693 = vrot.lane.b32.xlu1 %v1656_v3, %s2648_s15 }
 0x1eb   : > { %v1616_v2 = vpop.permute.xlu1 %1615 }
 0x1ec   : > { %v1657_v39 = vadd.f32 %v1616_v2, %v1497_v24  ;;  %v4155_v2 = vld [vmem:[#allocation10_spill] sm:$0xff] }
 0x1ed   : > { %v1501_v14 = vmul.f32 %v3751_v18, %v4155_v2 }
 0x1ee   : > { %1695 = vrot.lane.b32.xlu2 %v1657_v39, %s2648_s15 }
 0x1f2   : > { %v1620_v27 = vpop.permute.xlu0 %1619 }
 0x1f3   : > { %v1659_v35 = vadd.f32 %v1620_v27, %v1499_v52 }
 0x1f4   : > { %v1618_v8 = vpop.permute.xlu2 %1617  ;;  %v1628_v7 = vpop.permute.xlu1 %1627 }
 0x1f5   : > { %v1658_v61 = vadd.f32 %v1618_v8, %v1498_v56  ;;  %1699 = vrot.lane.b32.xlu1 %v1659_v35, %s2648_s15  ;;  %v1663_v25 = vadd.f32 %v1628_v7, %v1503_v4  ;;  %v4156_v8 = vld [vmem:[#allocation11_spill] sm:$0xff] }
 0x1f6   : > { %v1506_v13 = vmul.f32 %v3804_v9, %v4156_v8 }
 0x1f7   : > { %1697 = vrot.lane.b32.xlu0 %v1658_v61, %s2648_s15  ;;  %1707 = vrot.lane.b32.xlu2 %v1663_v25, %s2648_s15 }
 0x1fa   : > { %v1632_v50 = vpop.permute.xlu0 %1631 }
 0x1fb   : > { %v1665_v23 = vadd.f32 %v1632_v50, %v1505_v57 }
 0x1fc   : > { %v1630_v32 = vpop.permute.xlu2 %1629 }
 0x1fd   : > { %v1664_v55 = vadd.f32 %v1630_v32, %v1504_v5  ;;  %1711 = vrot.lane.b32.xlu1 %v1665_v23, %s2648_s15 }
 0x1ff   : > { %1709 = vrot.lane.b32.xlu0 %v1664_v55, %s2648_s15 }
 0x206   : > { %v1622_v3 = vpop.permute.xlu1 %1621 }
 0x207   : > { %v1660_v24 = vadd.f32 %v1622_v3, %v1500_v16 }
 0x209   : > { %1701 = vrot.lane.b32.xlu2 %v1660_v24, %s2648_s15 }
 0x20a   : > { %v1626_v39 = vpop.permute.xlu0 %1625 }
 0x20b   : > { %v1662_v56 = vadd.f32 %v1626_v39, %v1502_v63 }
 0x20c   : > { %v1624_v52 = vpop.permute.xlu2 %1623 }
 0x20d   : > { %v1661_v27 = vadd.f32 %v1624_v52, %v1501_v14  ;;  %1705 = vrot.lane.b32.xlu1 %v1662_v56, %s2648_s15 }
 0x20f   : > { %1703 = vrot.lane.b32.xlu0 %v1661_v27, %s2648_s15 }
 0x216   : > { %v1634_v35 = vpop.permute.xlu1 %1633 }
 0x217   : > { %1793 = vrot.lane.b32.xlu0 %v3804_v9, %s2649_s11  ;;  %v1666_v61 = vadd.f32 %v1634_v35, %v1506_v13 }
 0x219   : > { %1713 = vrot.lane.b32.xlu2 %v1666_v61, %s2648_s15  ;;  %s322_s15 = sand.u32 1, %s2637_s19  }
 0x21a   : > { %s2065_s8 = sshll.u32 %s322_s15, 7  ;;  %s1940_s22 = scalar_lea.sflag [#allocation4], %s322_s15 }
 0x21b   : > { %s3951_s9 = scalar_lea.vmem [#allocation5], %s2065_s8 }
 0x21c   : > { %s1952_s13 = sshll.u32 %s3951_s9, 4  ;;  %s1953_s13 = int_to_ptr.vmem [resolvable:$true] %s1952_s13 }
 0x221   : > { %1791 = vrot.lane.b32.xlu2 %v3783_v54, %s2649_s11 }
 0x224   : > { %v1684_v60 = vpop.permute.xlu2 %1683 }
 0x225   : > { %v1731_v4 = vmul.f32 %v1684_v60, %v3264_v22 }
 0x227   : > { %1827 = vrot.lane.b32.xlu1 %v1731_v4, %s2650_s14  ;;  %v4157_v4 = vld [vmem:[#allocation17_spill] sm:$0xff] }
 0x234   : > { %v3875_v7 = vpop.permute.xlu2 %1689 }
 0x235   : > { %v1734_v25 = vmul.f32 %v3875_v7, %v3380_v48 }
 0x237   : > { %v3879_v57 = vpop.permute.xlu1 %1687  ;;  %1833 = vrot.lane.b32.xlu1 %v1734_v25, %s2650_s14 }
 0x238   : > { %v1686_v5 = vpop.permute.xlu0 %1685  ;;  %v1733_v50 = vmul.f32 %v3879_v57, %v3476_v0 }
 0x239   : > { %v1732_v32 = vmul.f32 %v1686_v5, %v3480_v20 }
 0x23a   : > { %1831 = vrot.lane.b32.xlu0 %v1733_v50, %s2650_s14 }
 0x23b   : > { %1829 = vrot.lane.b32.xlu2 %v1732_v32, %s2650_s14 }
 0x248   : > { %v3887_v22 = vpop.permute.xlu2 %1695 }
 0x249   : > { %v1737_v23 = vmul.f32 %v3887_v22, %v3561_v31 }
 0x24b   : > { %1839 = vrot.lane.b32.xlu1 %v1737_v23, %s2650_s14 }
 0x251   : > { %v3892_v48 = vpop.permute.xlu2 %1707 }
 0x252   : > { %v1743_v0 = vmul.f32 %v3892_v48, %v3639_v40 }
 0x254   : > { %1851 = vrot.lane.b32.xlu1 %v1743_v0, %s2650_s14 }
 0x257   : > { %v1692_v20 = vpop.permute.xlu0 %1691  ;;  %v3897_v55 = vpop.permute.xlu1 %1693 }
 0x258   : > { %v1735_v16 = vmul.f32 %v1692_v20, %v3597_v62  ;;  %v1736_v3 = vmul.f32 %v3897_v55, %v3578_v37 }
 0x25a   : > { %1837 = vrot.lane.b32.xlu0 %v1736_v3, %s2650_s14  ;;  %1835 = vrot.lane.b32.xlu2 %v1735_v16, %s2650_s14 }
 0x263   : > { %v3904_v31 = vpop.permute.xlu2 %1701 }
 0x264   : > { %v1740_v24 = vmul.f32 %v3904_v31, %v3717_v45 }
 0x266   : > { %1845 = vrot.lane.b32.xlu1 %v1740_v24, %s2650_s14 }
 0x267   : > { %v3909_v40 = vpop.permute.xlu1 %1699 }
 0x268   : > { %v1739_v62 = vmul.f32 %v3909_v40, %v3703_v15 }
 0x269   : > { %v1698_v63 = vpop.permute.xlu0 %1697 }
 0x26a   : > { %v1738_v2 = vmul.f32 %v1698_v63, %v3711_v10  ;;  %1843 = vrot.lane.b32.xlu0 %v1739_v62, %s2650_s14 }
 0x26c   : > { %1841 = vrot.lane.b32.xlu2 %v1738_v2, %s2650_s14 }
 0x26f   : > { %v3921_v14 = vpop.permute.xlu1 %1711 }
 0x271   : > { %v3923_v39 = vpop.permute.xlu0 %1709 }
 0x272   : > { %v1744_v27 = vmul.f32 %v3923_v39, %v3744_v6 }
 0x273   : > { %v3916_v37 = vpop.permute.xlu2 %1713 }
 0x274   : > { %v1746_v45 = vmul.f32 %v3916_v37, %v3804_v9  ;;  %v1745_v9 = vmul.f32 %v3921_v14, %v3783_v54 }
 0x276   : > { %1857 = vrot.lane.b32.xlu1 %v1746_v45, %s2650_s14 }
 0x27b   : > { %v3940_v8 = vpop.permute.xlu2 %1791 }
 0x27f   : > { %v3925_v15 = vpop.permute.xlu1 %1705 }
 0x280   : > { %v1742_v52 = vmul.f32 %v3925_v15, %v3740_v49 }
 0x281   : > { %v3927_v10 = vpop.permute.xlu0 %1703 }
 0x282   : > { %v1741_v56 = vmul.f32 %v3927_v10, %v3751_v18  ;;  %1849 = vrot.lane.b32.xlu0 %v1742_v52, %s2650_s14 }
 0x284   : > { %1847 = vrot.lane.b32.xlu2 %v1741_v56, %s2650_s14 }
 0x289   : > { %v1794_v25 = vpop.permute.xlu0 %1793 }
 0x28a   : > { %1855 = vrot.lane.b32.xlu0 %v1745_v9, %s2650_s14 }
 0x28c   : > { %1853 = vrot.lane.b32.xlu2 %v1744_v27, %s2650_s14 }
 0x295   : > { %v1830_v49 = vpop.permute.xlu2 %1829 }
 0x296   : > { %v1876_v18 = vsel %vm1036_vm0, %v3777_v43, %v1830_v49  ;;  %v4159_v49 = vld [vmem:[#allocation15_spill] sm:$0xff] }
 0x297   : > { %v1892_v13 = vsel %vm1053_vm2, %v1876_v18, %v1686_v5 }
 0x298   : > { %v1908_v54 = vsel %vm1070_vm1, %v1892_v13, %v3322_v51  ;;  %v4160_v13 = vld [vmem:[#allocation20_spill] sm:$0xff] }
 0x299   : > { %1924 = vst [vmem:[%s3951_s9 + $0x8] sm:$0xff] %v1908_v54  ;;  %v1828_v6 = vpop.permute.xlu1 %1827 }
 0x29a   : > { %v1875_v35 = vsel %vm1036_vm0, %v3760_v59, %v1828_v6  ;;  %v4161_v6 = vld [vmem:[#allocation19_spill] sm:$0xff] }
 0x29b   : > { %v1891_v61 = vsel %vm1053_vm2, %v1875_v35, %v1684_v60 }
 0x29c   : > { %v1907_v43 = vsel %vm1070_vm1, %v1891_v61, %v4157_v4 }
 0x29d   : > { %1923 = vst [vmem:[%s3951_s9] sm:$0xff] %v1907_v43 }
 0x2a9   : > { %v1834_v51 = vpop.permute.xlu1 %1833 }
 0x2aa   : > { %v1878_v5 = vsel %vm1036_vm0, %v3769_v29, %v1834_v51 }
 0x2ab   : > { %v1894_v32 = vsel %vm1053_vm2, %v1878_v5, %v3875_v7 }
 0x2ac   : > { %v1832_v50 = vpop.permute.xlu0 %1831  ;;  %v1910_v60 = vsel %vm1070_vm1, %v1894_v32, %v3292_v42 }
 0x2ad   : > { %v1877_v59 = vsel %vm1036_vm0, %v3763_v1, %v1832_v50  ;;  %1926 = vst [vmem:[%s3951_s9 + $0x18] sm:$0xff] %v1910_v60 }
 0x2ae   : > { %v1893_v23 = vsel %vm1053_vm2, %v1877_v59, %v3879_v57 }
 0x2af   : > { %v1909_v0 = vsel %vm1070_vm1, %v1893_v23, %v3311_v44 }
 0x2b0   : > { %1925 = vst [vmem:[%s3951_s9 + $0x10] sm:$0xff] %v1909_v0 }
 0x2b4   : > { %v1836_v29 = vpop.permute.xlu2 %1835 }
 0x2b5   : > { %v1879_v7 = vsel %vm1036_vm0, %v3793_v47, %v1836_v29 }
 0x2b6   : > { %v1895_v16 = vsel %vm1053_vm2, %v1879_v7, %v1692_v20 }
 0x2b7   : > { %v1911_v1 = vsel %vm1070_vm1, %v1895_v16, %v3533_v11 }
 0x2b8   : > { %1927 = vst [vmem:[%s3951_s9 + $0x20] sm:$0xff] %v1911_v1 }
 0x2bd   : > { %v1840_v42 = vpop.permute.xlu1 %1839 }
 0x2be   : > { %v1881_v57 = vsel %vm1036_vm0, %v3789_v30, %v1840_v42 }
 0x2bf   : > { %v1897_v44 = vsel %vm1053_vm2, %v1881_v57, %v3887_v22 }
 0x2c0   : > { %v1913_v3 = vsel %vm1070_vm1, %v1897_v44, %v3417_v38 }
 0x2c1   : > { %1929 = vst [vmem:[%s3951_s9 + $0x30] sm:$0xff] %v1913_v3 }
 0x2c6   : > { %v1842_v47 = vpop.permute.xlu2 %1841  ;;  %v1852_v24 = vpop.permute.xlu1 %1851 }
 0x2c7   : > { %v1882_v20 = vsel %vm1036_vm0, %v3809_v46, %v1842_v47  ;;  %v1887_v30 = vsel %vm1036_vm0, %v3800_v19, %v1852_v24 }
 0x2c8   : > { %v1898_v11 = vsel %vm1053_vm2, %v1882_v20, %v1698_v63  ;;  %v1903_v38 = vsel %vm1053_vm2, %v1887_v30, %v3892_v48 }
 0x2c9   : > { %v1914_v62 = vsel %vm1070_vm1, %v1898_v11, %v3629_v58  ;;  %v1919_v22 = vsel %vm1070_vm1, %v1903_v38, %v3500_v12 }
 0x2ca   : > { %1930 = vst [vmem:[%s3951_s9 + $0x38] sm:$0xff] %v1914_v62 }
 0x2cb   : > { %1935 = vst [vmem:[%s3951_s9 + $0x60] sm:$0xff] %v1919_v22 }
 0x2cc   : > { %v1838_v2 = vpop.permute.xlu0 %1837 }
 0x2cd   : > { %v1880_v46 = vsel %vm1036_vm0, %v3773_v34, %v1838_v2 }
 0x2ce   : > { %v1896_v63 = vsel %vm1053_vm2, %v1880_v46, %v3897_v55 }
 0x2cf   : > { %v1912_v58 = vsel %vm1070_vm1, %v1896_v63, %v3513_v53 }
 0x2d0   : > { %1928 = vst [vmem:[%s3951_s9 + $0x28] sm:$0xff] %v1912_v58 }
 0x2d8   : > { %v1846_v19 = vpop.permute.xlu1 %1845 }
 0x2d9   : > { %v1884_v48 = vsel %vm1036_vm0, %v3815_v28, %v1846_v19 }
 0x2da   : > { %v1900_v12 = vsel %vm1053_vm2, %v1884_v48, %v3904_v31 }
 0x2db   : > { %v1916_v45 = vsel %vm1070_vm1, %v1900_v12, %v3583_v17 }
 0x2dc   : > { %1932 = vst [vmem:[%s3951_s9 + $0x48] sm:$0xff] %v1916_v45  ;;  %v1844_v34 = vpop.permute.xlu0 %1843 }
 0x2dd   : > { %v1883_v55 = vsel %vm1036_vm0, %v3791_v36, %v1844_v34 }
 0x2de   : > { %v1848_v52 = vpop.permute.xlu2 %1847  ;;  %v1899_v53 = vsel %vm1053_vm2, %v1883_v55, %v3909_v40 }
 0x2df   : > { %v1885_v28 = vsel %vm1036_vm0, %v3819_v26, %v1848_v52  ;;  %v1915_v31 = vsel %vm1070_vm1, %v1899_v53, %v3615_v41  ;;  %v4158_v41 = vld [vmem:[#allocation12_spill] sm:$0xff] }
 0x2e0   : > { %v1901_v17 = vsel %vm1053_vm2, %v1885_v28, %v3927_v10  ;;  %1931 = vst [vmem:[%s3951_s9 + $0x40] sm:$0xff] %v1915_v31 }
 0x2e1   : > { %v1917_v56 = vsel %vm1070_vm1, %v1901_v17, %v3725_v21 }
 0x2e2   : > { %1933 = vst [vmem:[%s3951_s9 + $0x50] sm:$0xff] %v1917_v56 }
 0x2e6   : > { %v1854_v36 = vpop.permute.xlu2 %1853 }
 0x2e7   : > { %v1888_v40 = vsel %vm1036_vm0, %v3813_v33, %v1854_v36 }
 0x2e8   : > { %v1904_v26 = vsel %vm1053_vm2, %v1888_v40, %v3923_v39  ;;  %v1858_v9 = vpop.permute.xlu1 %1857 }
 0x2e9   : > { %v1920_v27 = vsel %vm1070_vm1, %v1904_v26, %v4158_v41  ;;  %v1890_v10 = vsel %vm1036_vm0, %v1794_v25, %v1858_v9 }
 0x2ea   : > { %1936 = vst [vmem:[%s3951_s9 + $0x68] sm:$0xff] %v1920_v27  ;;  %v1906_v21 = vsel %vm1053_vm2, %v1890_v10, %v3916_v37 }
 0x2eb   : > { %v1922_v18 = vsel %vm1070_vm1, %v1906_v21, %v4159_v49 }
 0x2ec   : > { %1938 = vst [vmem:[%s3951_s9 + $0x78] sm:$0xff] %v1922_v18 }
 0x2f4   : > { %v1850_v33 = vpop.permute.xlu0 %1849 }
 0x2f5   : > { %v1886_v39 = vsel %vm1036_vm0, %v4160_v13, %v1850_v33 }
 0x2f6   : > { %v1902_v54 = vsel %vm1053_vm2, %v1886_v39, %v3925_v15  ;;  %v4162_v15 = vld [vmem:[#allocation18_spill] sm:$0xff] }
 0x2f7   : > { %v1918_v35 = vsel %vm1070_vm1, %v1902_v54, %v4161_v6 }
 0x2f8   : > { %1934 = vst [vmem:[%s3951_s9 + $0x58] sm:$0xff] %v1918_v35 }
 0x2fc   : > { %v1856_v37 = vpop.permute.xlu0 %1855 }
 0x2fd   : > { %v1889_v61 = vsel %vm1036_vm0, %v3940_v8, %v1856_v37 }
 0x2fe   : > { %v1905_v4 = vsel %vm1053_vm2, %v1889_v61, %v3921_v14 }
 0x2ff   : > { %v1921_v43 = vsel %vm1070_vm1, %v1905_v4, %v4162_v15 }
 0x300   : > { %1937 = vst [vmem:[%s3951_s9 + $0x70] sm:$0xff] %v1921_v43 }
 0x301   : > { %2606 = shalt.err (!%p2603_p12)
}
 0x302   : > { %s2651_s15 = smov 128   ;;  %s2652_s8 = smov 8  }
 0x303   : > { %2401 = dma.vmem_to_hbm [thread:$0]  (%p2721_p5), %s1953_s13, 2048, %s1955_s16, %s1940_s22, %s2651_s15, %s2651_s15, %s2652_s8  }
 0x304 PF: > { %p2413_p13 = scmp.ge.s32.totalorder %s2645_s21, 2  ;;  %s1969_s9 = sand.u32 1, %s2633_s18  }
 0x305   : > { %s1970_s10 = scalar_lea.sflag [#allocation4], %s1969_s9 }
 0x306   : > { %p2408_p0 = pnand %p2413_p13, %p2725_p6 }
 0x308   : > { %p2409_p1 = pneg %p2408_p0 }
 0x30a   : > { %2628 = dma.done.wait (%p2409_p1), %s1970_s10, 2048  }
 0x30b   : > { %2630 = vsyncadd (%p2409_p1), %s1970_s10, 4294965248  ;;  %p16_p2 = scmp.ge.s32.totalorder %s2708_s24, 6   ;;  %s4163_s18 = smov %s2637_s19 }
 0x30c   : > { %s4164_s19 = smov %s2641_s20  ;;  %s4165_s20 = smov %s2719_s27 }
 0x30d   : > { %s4166_s21 = smov %s2708_s24  ;;  %18 = sbr.rel (!%p16_p2) target bundleno = 4 (0x4), region = 88 }
 0x312   :  { %1976 = vsyncpa [#allocation3], 1 }
 0x313   :  { %1978 = vsyncpa [#allocation3 + $0x1], 1 }
 0x314   :  { %1979 = vsyncpa [#allocation4], 1 }
 0x315   :  { %1981 = vsyncpa [#allocation4 + $0x1], 1 }

</bundles_post_ra>
